<compile_context>
chip_gen: v7x
topology: tpu7x:2x2x1
jax: 0.10.0
libtpu: 0.0.40
codegen_flags: <defaults>
</compile_context>

<pallas_src>
import functools

import jax
import jax.numpy as jnp
from jax.experimental import pallas as pl
from jax.experimental.pallas import tpu as pltpu

# Out-features of the encoder Linear layers at layer_indices=[0,3,6,9,12,15].
# All multiples of 8 (sublane tile) -- required by the 8-row partial fold.
LAYER_CHANNELS = [8, 16, 16, 16, 32, 32]
EPS = 1e-10


def _loss_kernel(*refs, inv_total, chunk):
    """Grid = (batch, split, spatial_tile).

    refs = (x0, x1, W_0..W_5, b_0..b_5, lin_0..lin_5, out, acc)
      x0, x1 : (1, C_in, TP)   channels on sublanes, spatial on lanes
      W_k    : (C_k, C_{k-1})  encoder Linear weights (torch [out, in])
      b_k    : (C_k, 1)        encoder Linear biases
      lin_k  : (C_k, 1)        NetLinLayer 1x1-conv weights (no bias)
      out    : (1, 1, 1, 1)    per-(sample, split) partial loss
      acc    : (1, 1) f32 VMEM running sum over this split's spatial tiles
    """
    n_layers = len(LAYER_CHANNELS)
    x0_ref, x1_ref = refs[0], refs[1]
    w_refs = refs[2:2 + n_layers]
    b_refs = refs[2 + n_layers:2 + 2 * n_layers]
    lw_refs = refs[2 + 2 * n_layers:2 + 3 * n_layers]
    out_ref = refs[2 + 3 * n_layers]
    acc_ref = refs[3 + 3 * n_layers]

    p_idx = pl.program_id(2)

    @pl.when(p_idx == 0)
    def _init():
        acc_ref[...] = jnp.zeros_like(acc_ref)

    tp = x0_ref.shape[-1]
    n_chunks = tp // chunk

    def chunk_body(c, part8):
        off = pl.multiple_of(c * chunk, 128)
        x0c = x0_ref[0, :, pl.ds(off, chunk)].astype(jnp.float32)
        x1c = x1_ref[0, :, pl.ds(off, chunk)].astype(jnp.float32)
        # Fuse both streams along lanes: each encoder layer needs one matmul
        # that reuses the pushed weights for both streams.
        h = jnp.concatenate([x0c, x1c], axis=-1)                # (C_in, 2*chunk)

        for k in range(n_layers):
            # Encoder block: ReLU (except before the first Linear) -> Linear.
            a = h if k == 0 else jnp.maximum(h, 0.0)
            h = jnp.dot(w_refs[k][...], a,
                        preferred_element_type=jnp.float32) + b_refs[k][...]

            # normalize_tensor: L2-normalize over channels (sublane axis).
            ss = jnp.sum(h * h, axis=0, keepdims=True)          # (1, 2*chunk)
            inv_norm = pl.reciprocal(jnp.sqrt(ss) + EPS, approx=True)
            nrm = h * inv_norm                                  # (C_k, 2*chunk)

            # Squared diff of the two streams; 1x1-conv weight folded in.
            d = nrm[:, :chunk] - nrm[:, chunk:]                 # (C_k, chunk)
            wd = d * d * lw_refs[k][...]                        # (C_k, chunk)

            # Deferred reduction: dense 8-row partial (pure vreg adds,
            # sublane-tile-aligned static slices; C_k is a multiple of 8).
            for r in range(0, LAYER_CHANNELS[k], 8):
                part8 = part8 + wd[r:r + 8, :]
        return part8

    part8 = jax.lax.fori_loop(0, n_chunks, chunk_body,
                              jnp.zeros((8, chunk), jnp.float32),
                              unroll=True)

    # One sublane collapse + one cross-lane reduce per tile (not per layer).
    tile_sum = jnp.sum(jnp.sum(part8, axis=0, keepdims=True),
                       axis=1, keepdims=True)                   # (1, 1)
    acc_ref[...] = acc_ref[...] + tile_sum

    @pl.when(p_idx == pl.num_programs(2) - 1)
    def _finalize():
        # spatial_average (sum * 1/P over the ORIGINAL spatial size), summed
        # over layers; padded points contribute exactly zero.
        out_ref[...] = (acc_ref[...] * inv_total).reshape(1, 1, 1, 1)


def cluster_perceptual_loss(x0_nchw, x1_nchw, params, *, tile_p=1024,
                            inner_chunk=128):
    """Pallas wrapper.  x0_nchw, x1_nchw: (N, C, H, W), any float dtype.

    tile_p is the spatial BlockSpec tile (sweepable in {512,1024,2048});
    inner_chunk is the in-kernel strip-mining width per stream.
    """
    enc_w, enc_b, lin_w = params
    N, C, H, W = x0_nchw.shape
    P = H * W

    # Spatial tiling: tile is a multiple of 128 lanes; the spatial axis is
    # zero-padded up to a multiple of the tile (no full-P fallback -- that
    # path could exceed v7x's 64 MiB VMEM for large images).
    p128 = pl.cdiv(P, 128) * 128
    tp = max(128, min((tile_p // 128) * 128, p128))
    p_pad = pl.cdiv(P, tp) * tp
    num_tiles = p_pad // tp

    # Inner strip-mining chunk (per stream); 128 keeps the per-chunk layer
    # chain register-resident even on v5e (1 vst slot).
    chunk = max(128, (min(inner_chunk, tp) // 128) * 128)
    if tp % chunk != 0:
        chunk = 128

    # Split the spatial reduction in two so both v7x TensorCores get work
    # even when N is small (neutral on single-TC v5e/v6e).
    n_split = 2 if (num_tiles % 2 == 0 and num_tiles >= 2) else 1
    tiles_per_split = num_tiles // n_split

    # NCHW -> (N, C, H*W): pure reshape, native dtype (cast happens in-kernel
    # after the load, so bf16 inputs halve per-tile DMA bytes).
    def prep(x):
        x = x.reshape(N, C, P)
        if p_pad > P:
            x = jnp.pad(x, ((0, 0), (0, 0), (0, p_pad - P)))
        return x

    x0, x1 = prep(x0_nchw), prep(x1_nchw)

    def x_map(n, s, p, _t=tiles_per_split):
        return (n, 0, s * _t + p)

    in_specs = [pl.BlockSpec((1, C, tp), x_map),
                pl.BlockSpec((1, C, tp), x_map)]
    # Weights are tiny and grid-invariant: full blocks, constant index maps
    # (stay resident in VMEM across the whole grid).
    for arr in (*enc_w, *enc_b, *lin_w):
        in_specs.append(pl.BlockSpec(arr.shape, lambda n, s, p: (0, 0)))

    kernel = functools.partial(_loss_kernel, inv_total=1.0 / float(P),
                               chunk=chunk)

    out = pl.pallas_call(
        kernel,
        out_shape=jax.ShapeDtypeStruct((N, n_split, 1, 1), jnp.float32),
        grid=(N, n_split, tiles_per_split),
        in_specs=in_specs,
        out_specs=pl.BlockSpec((1, 1, 1, 1), lambda n, s, p: (n, s, 0, 0)),
        scratch_shapes=[pltpu.VMEM((1, 1), jnp.float32)],
        compiler_params=pltpu.CompilerParams(
            dimension_semantics=("parallel", "parallel", "arbitrary")),
    )(x0, x1, *enc_w, *enc_b, *lin_w)

    # Sum the per-core partial sums (cheap (N, n_split) reduce in the wrapper).
    return jnp.sum(out, axis=1, keepdims=True)


def make_params(key, c_in):
    """Deterministic synthetic weights (stands in for the checkpoint)."""
    # TODO(synk): real weights come from instantiate_from_config + torch.load;
    # synthesized here since the checkpoint cannot be read in-script.
    enc_w, enc_b, lin_w = [], [], []
    c_prev = c_in
    for ck in LAYER_CHANNELS:
        key, k1, k2, k3 = jax.random.split(key, 4)
        scale = 1.0 / jnp.sqrt(jnp.float32(c_prev))
        enc_w.append(jax.random.normal(k1, (ck, c_prev), jnp.float32) * scale)
        enc_b.append(jax.random.normal(k2, (ck, 1), jnp.float32) * 0.1)
        lin_w.append(jax.random.normal(k3, (ck, 1), jnp.float32))
        c_prev = ck
    return enc_w, enc_b, lin_w


def reference_loss(x0_nchw, x1_nchw, params):
    """Pure-JAX reference mirroring the torch NCHW semantics."""
    enc_w, enc_b, lin_w = params
    N, C, H, W = x0_nchw.shape

    def encode(x):
        h = jnp.transpose(x, (0, 2, 3, 1)).reshape(N, H * W, C)
        outs = []
        for k, (w, b) in enumerate(zip(enc_w, enc_b)):
            a = h if k == 0 else jnp.maximum(h, 0.0)
            h = a @ w.T + b[:, 0]
            outs.append(jnp.transpose(h.reshape(N, H, W, -1), (0, 3, 1, 2)))
        return outs

    outs0, outs1 = encode(x0_nchw), encode(x1_nchw)
    val = jnp.zeros((N, 1, 1, 1), jnp.float32)
    for k in range(len(LAYER_CHANNELS)):
        f0 = outs0[k] / (jnp.sqrt(jnp.sum(outs0[k] ** 2, axis=1, keepdims=True)) + EPS)
        f1 = outs1[k] / (jnp.sqrt(jnp.sum(outs1[k] ** 2, axis=1, keepdims=True)) + EPS)
        d = (f0 - f1) ** 2
        conv = jnp.einsum('nchw,c->nhw', d, lin_w[k][:, 0])[:, None, :, :]
        val = val + jnp.mean(conv, axis=(2, 3), keepdims=True)
    return val


if __name__ == "__main__":
    key = jax.random.PRNGKey(0)
    kx0, kx1, kp, kr0, kr1 = jax.random.split(key, 5)

    N, C_IN, H, W = 2, 4, 16, 16
    x0 = jax.random.normal(kx0, (N, C_IN, H, W), jnp.float32)
    x1 = jax.random.normal(kx1, (N, C_IN, H, W), jnp.float32)
    params = make_params(kp, C_IN)

    ref = jax.block_until_ready(reference_loss(x0, x1, params))

    # Path A: two spatial tiles -> dual-TC split path, grid (N, 2, 1).
    out_a = jax.block_until_ready(
        cluster_perceptual_loss(x0, x1, params, tile_p=128))
    # Path B: one spatial tile, two inner 128-lane chunks, grid (N, 1, 1).
    out_b = jax.block_until_ready(
        cluster_perceptual_loss(x0, x1, params, tile_p=256))

    assert out_a.shape == (N, 1, 1, 1) and out_b.shape == (N, 1, 1, 1)
    # atol widened to 1e-4 to cover the EUP approx-reciprocal norm path.
    assert jnp.allclose(out_a, ref, rtol=1e-3, atol=1e-4), (out_a, ref)
    assert jnp.allclose(out_b, ref, rtol=1e-3, atol=1e-4), (out_b, ref)

    # Ragged spatial size (P = 126 < 128) exercises the zero-pad path.
    x0r = jax.random.normal(kr0, (1, C_IN, 9, 14), jnp.float32)
    x1r = jax.random.normal(kr1, (1, C_IN, 9, 14), jnp.float32)
    out_r = jax.block_until_ready(cluster_perceptual_loss(x0r, x1r, params))
    ref_r = jax.block_until_ready(reference_loss(x0r, x1r, params))
    assert jnp.allclose(out_r, ref_r, rtol=1e-3, atol=1e-4), (out_r, ref_r)

    print("KERNEL_OK")
</pallas_src>

<mosaic_0001>
module attributes {stable_mosaic.version = 11 : i64} {
  func.func @_loss_kernel(%arg0: i32, %arg1: i32, %arg2: i32, %arg3: memref<1x4x128xf32, #tpu.memory_space<vmem>>, %arg4: memref<1x4x128xf32, #tpu.memory_space<vmem>>, %arg5: memref<8x4xf32, #tpu.memory_space<vmem>>, %arg6: memref<16x8xf32, #tpu.memory_space<vmem>>, %arg7: memref<16x16xf32, #tpu.memory_space<vmem>>, %arg8: memref<16x16xf32, #tpu.memory_space<vmem>>, %arg9: memref<32x16xf32, #tpu.memory_space<vmem>>, %arg10: memref<32x32xf32, #tpu.memory_space<vmem>>, %arg11: memref<8x1xf32, #tpu.memory_space<vmem>>, %arg12: memref<16x1xf32, #tpu.memory_space<vmem>>, %arg13: memref<16x1xf32, #tpu.memory_space<vmem>>, %arg14: memref<16x1xf32, #tpu.memory_space<vmem>>, %arg15: memref<32x1xf32, #tpu.memory_space<vmem>>, %arg16: memref<32x1xf32, #tpu.memory_space<vmem>>, %arg17: memref<8x1xf32, #tpu.memory_space<vmem>>, %arg18: memref<16x1xf32, #tpu.memory_space<vmem>>, %arg19: memref<16x1xf32, #tpu.memory_space<vmem>>, %arg20: memref<16x1xf32, #tpu.memory_space<vmem>>, %arg21: memref<32x1xf32, #tpu.memory_space<vmem>>, %arg22: memref<32x1xf32, #tpu.memory_space<vmem>>, %arg23: memref<1x1x1x1xf32, #tpu.memory_space<vmem>>, %arg24: memref<1x1xf32, #tpu.memory_space<vmem>>) attributes {dimension_semantics = [#tpu.dimension_semantics<parallel>, #tpu.dimension_semantics<parallel>, #tpu.dimension_semantics<arbitrary>], iteration_bounds = array<i64: 2, 2, 1>, scalar_prefetch = 0 : i64, scratch_operands = 1 : i64, tpu.core_type = #tpu.core_type<tc>, window_params = [{transform_indices = @transform_0, window_bounds = array<i64: 1, 4, 128>}, {transform_indices = @transform_1, window_bounds = array<i64: 1, 4, 128>}, {pipeline_mode = #tpu.pipeline_mode<synchronous>, transform_indices = @transform_2, window_bounds = array<i64: 8, 4>}, {pipeline_mode = #tpu.pipeline_mode<synchronous>, transform_indices = @transform_3, window_bounds = array<i64: 16, 8>}, {pipeline_mode = #tpu.pipeline_mode<synchronous>, transform_indices = @transform_4, window_bounds = array<i64: 16, 16>}, {pipeline_mode = #tpu.pipeline_mode<synchronous>, transform_indices = @transform_5, window_bounds = array<i64: 16, 16>}, {pipeline_mode = #tpu.pipeline_mode<synchronous>, transform_indices = @transform_6, window_bounds = array<i64: 32, 16>}, {pipeline_mode = #tpu.pipeline_mode<synchronous>, transform_indices = @transform_7, window_bounds = array<i64: 32, 32>}, {pipeline_mode = #tpu.pipeline_mode<synchronous>, transform_indices = @transform_8, window_bounds = array<i64: 8, 1>}, {pipeline_mode = #tpu.pipeline_mode<synchronous>, transform_indices = @transform_9, window_bounds = array<i64: 16, 1>}, {pipeline_mode = #tpu.pipeline_mode<synchronous>, transform_indices = @transform_10, window_bounds = array<i64: 16, 1>}, {pipeline_mode = #tpu.pipeline_mode<synchronous>, transform_indices = @transform_11, window_bounds = array<i64: 16, 1>}, {pipeline_mode = #tpu.pipeline_mode<synchronous>, transform_indices = @transform_12, window_bounds = array<i64: 32, 1>}, {pipeline_mode = #tpu.pipeline_mode<synchronous>, transform_indices = @transform_13, window_bounds = array<i64: 32, 1>}, {pipeline_mode = #tpu.pipeline_mode<synchronous>, transform_indices = @transform_14, window_bounds = array<i64: 8, 1>}, {pipeline_mode = #tpu.pipeline_mode<synchronous>, transform_indices = @transform_15, window_bounds = array<i64: 16, 1>}, {pipeline_mode = #tpu.pipeline_mode<synchronous>, transform_indices = @transform_16, window_bounds = array<i64: 16, 1>}, {pipeline_mode = #tpu.pipeline_mode<synchronous>, transform_indices = @transform_17, window_bounds = array<i64: 16, 1>}, {pipeline_mode = #tpu.pipeline_mode<synchronous>, transform_indices = @transform_18, window_bounds = array<i64: 32, 1>}, {pipeline_mode = #tpu.pipeline_mode<synchronous>, transform_indices = @transform_19, window_bounds = array<i64: 32, 1>}, {transform_indices = @transform_20, window_bounds = array<i64: 1, 1, 1, 1>}]} {
    %c0_i32 = arith.constant 0 : i32
    %0 = arith.cmpi eq, %arg2, %c0_i32 : i32
    %1 = arith.extui %0 : i1 to i32
    %c0_i32_0 = arith.constant 0 : i32
    %2 = arith.cmpi ne, %1, %c0_i32_0 : i32
    scf.if %2 {
      %cst_72 = arith.constant 0.000000e+00 : f32
      %188 = vector.broadcast %cst_72 : f32 to vector<1x1xf32>
      %c0_73 = arith.constant 0 : index
      %c0_74 = arith.constant 0 : index
      %189 = vector.load %arg24[%c0_73, %c0_74] : memref<1x1xf32, #tpu.memory_space<vmem>>, vector<1x1xf32>
      tpu.vector_store %arg24[%c0_73, %c0_74], %188 {strides = array<i32>} : memref<1x1xf32, #tpu.memory_space<vmem>>, vector<1x1xf32>,
    } else {
    }
    %cst = arith.constant 0.000000e+00 : f32
    %3 = vector.broadcast %cst : f32 to vector<8x128xf32>
    %c0_i32_1 = arith.constant 0 : i32
    %c128_i32 = arith.constant 128 : i32
    %4 = arith.muli %c0_i32_1, %c128_i32 : i32
    %5 = tpu.assume_multiple %4, 128 : i32
    %c0 = arith.constant 0 : index
    %c0_2 = arith.constant 0 : index
    %6 = arith.index_cast %5 : i32 to index
    %7 = vector.load %arg3[%c0, %c0_2, %6] : memref<1x4x128xf32, #tpu.memory_space<vmem>>, vector<1x4x128xf32>
    %8 = vector.shape_cast %7 : vector<1x4x128xf32> to vector<4x128xf32>
    %c0_3 = arith.constant 0 : index
    %c0_4 = arith.constant 0 : index
    %9 = arith.index_cast %5 : i32 to index
    %10 = vector.load %arg4[%c0_3, %c0_4, %9] : memref<1x4x128xf32, #tpu.memory_space<vmem>>, vector<1x4x128xf32>
    %11 = vector.shape_cast %10 : vector<1x4x128xf32> to vector<4x128xf32>
    %12 = tpu.concatenate %8, %11 in 1 : vector<4x128xf32>, vector<4x128xf32> -> vector<4x256xf32>
    %c0_5 = arith.constant 0 : index
    %c0_6 = arith.constant 0 : index
    %13 = vector.load %arg5[%c0_5, %c0_6] : memref<8x4xf32, #tpu.memory_space<vmem>>, vector<8x4xf32>
    %cst_7 = arith.constant dense<0.000000e+00> : vector<8x256xf32>
    %14 = tpu.matmul %13, %12, %cst_7 {dimension_numbers = #tpu.dot_dimension_numbers<[1], [0], [0], [1], [0, 0, 1, 1], [], []>} : vector<8x4xf32>, vector<4x256xf32>, vector<8x256xf32> -> vector<8x256xf32>
    %c0_8 = arith.constant 0 : index
    %c0_9 = arith.constant 0 : index
    %15 = vector.load %arg11[%c0_8, %c0_9] : memref<8x1xf32, #tpu.memory_space<vmem>>, vector<8x1xf32>
    %16 = vector.broadcast %15 : vector<8x1xf32> to vector<8x256xf32>
    %17 = arith.addf %14, %16 : vector<8x256xf32>
    %18 = arith.mulf %17, %17 : vector<8x256xf32>
    %cst_10 = arith.constant dense<0.000000e+00> : vector<256xf32>
    %19 = vector.multi_reduction <add>, %18, %cst_10 [0] : vector<8x256xf32> to vector<256xf32>
    %20 = vector.shape_cast %19 : vector<256xf32> to vector<1x256xf32>
    %21 = math.sqrt %20 : vector<1x256xf32>
    %cst_11 = arith.constant 1.000000e-10 : f32
    %22 = vector.broadcast %cst_11 : f32 to vector<1x256xf32>
    %23 = arith.addf %21, %22 : vector<1x256xf32>
    %24 = tpu.reciprocal %23 {approx = true} : vector<1x256xf32> -> vector<1x256xf32>
    %25 = vector.broadcast %24 : vector<1x256xf32> to vector<8x256xf32>
    %26 = arith.mulf %17, %25 : vector<8x256xf32>
    %27 = vector.extract_strided_slice %26 {offsets = [0, 0], sizes = [8, 128], strides = [1, 1]} : vector<8x256xf32> to vector<8x128xf32>
    %28 = vector.extract_strided_slice %26 {offsets = [0, 128], sizes = [8, 128], strides = [1, 1]} : vector<8x256xf32> to vector<8x128xf32>
    %29 = arith.subf %27, %28 : vector<8x128xf32>
    %30 = arith.mulf %29, %29 : vector<8x128xf32>
    %c0_12 = arith.constant 0 : index
    %c0_13 = arith.constant 0 : index
    %31 = vector.load %arg17[%c0_12, %c0_13] : memref<8x1xf32, #tpu.memory_space<vmem>>, vector<8x1xf32>
    %32 = vector.broadcast %31 : vector<8x1xf32> to vector<8x128xf32>
    %33 = arith.mulf %30, %32 : vector<8x128xf32>
    %34 = arith.addf %3, %33 : vector<8x128xf32>
    %cst_14 = arith.constant 0.000000e+00 : f32
    %35 = vector.broadcast %cst_14 : f32 to vector<8x256xf32>
    %36 = arith.maximumf %17, %35 : vector<8x256xf32>
    %c0_15 = arith.constant 0 : index
    %c0_16 = arith.constant 0 : index
    %37 = vector.load %arg6[%c0_15, %c0_16] : memref<16x8xf32, #tpu.memory_space<vmem>>, vector<16x8xf32>
    %cst_17 = arith.constant dense<0.000000e+00> : vector<16x256xf32>
    %38 = tpu.matmul %37, %36, %cst_17 {dimension_numbers = #tpu.dot_dimension_numbers<[1], [0], [0], [1], [0, 0, 1, 1], [], []>} : vector<16x8xf32>, vector<8x256xf32>, vector<16x256xf32> -> vector<16x256xf32>
    %c0_18 = arith.constant 0 : index
    %c0_19 = arith.constant 0 : index
    %39 = vector.load %arg12[%c0_18, %c0_19] : memref<16x1xf32, #tpu.memory_space<vmem>>, vector<16x1xf32>
    %40 = vector.broadcast %39 : vector<16x1xf32> to vector<16x256xf32>
    %41 = arith.addf %38, %40 : vector<16x256xf32>
    %42 = arith.mulf %41, %41 : vector<16x256xf32>
    %cst_20 = arith.constant dense<0.000000e+00> : vector<256xf32>
    %43 = vector.multi_reduction <add>, %42, %cst_20 [0] : vector<16x256xf32> to vector<256xf32>
    %44 = vector.shape_cast %43 : vector<256xf32> to vector<1x256xf32>
    %45 = math.sqrt %44 : vector<1x256xf32>
    %cst_21 = arith.constant 1.000000e-10 : f32
    %46 = vector.broadcast %cst_21 : f32 to vector<1x256xf32>
    %47 = arith.addf %45, %46 : vector<1x256xf32>
    %48 = tpu.reciprocal %47 {approx = true} : vector<1x256xf32> -> vector<1x256xf32>
    %49 = vector.broadcast %48 : vector<1x256xf32> to vector<16x256xf32>
    %50 = arith.mulf %41, %49 : vector<16x256xf32>
    %51 = vector.extract_strided_slice %50 {offsets = [0, 0], sizes = [16, 128], strides = [1, 1]} : vector<16x256xf32> to vector<16x128xf32>
    %52 = vector.extract_strided_slice %50 {offsets = [0, 128], sizes = [16, 128], strides = [1, 1]} : vector<16x256xf32> to vector<16x128xf32>
    %53 = arith.subf %51, %52 : vector<16x128xf32>
    %54 = arith.mulf %53, %53 : vector<16x128xf32>
    %c0_22 = arith.constant 0 : index
    %c0_23 = arith.constant 0 : index
    %55 = vector.load %arg18[%c0_22, %c0_23] : memref<16x1xf32, #tpu.memory_space<vmem>>, vector<16x1xf32>
    %56 = vector.broadcast %55 : vector<16x1xf32> to vector<16x128xf32>
    %57 = arith.mulf %54, %56 : vector<16x128xf32>
    %58 = vector.extract_strided_slice %57 {offsets = [0, 0], sizes = [8, 128], strides = [1, 1]} : vector<16x128xf32> to vector<8x128xf32>
    %59 = arith.addf %34, %58 : vector<8x128xf32>
    %60 = vector.extract_strided_slice %57 {offsets = [8, 0], sizes = [8, 128], strides = [1, 1]} : vector<16x128xf32> to vector<8x128xf32>
    %61 = arith.addf %59, %60 : vector<8x128xf32>
    %cst_24 = arith.constant 0.000000e+00 : f32
    %62 = vector.broadcast %cst_24 : f32 to vector<16x256xf32>
    %63 = arith.maximumf %41, %62 : vector<16x256xf32>
    %c0_25 = arith.constant 0 : index
    %c0_26 = arith.constant 0 : index
    %64 = vector.load %arg7[%c0_25, %c0_26] : memref<16x16xf32, #tpu.memory_space<vmem>>, vector<16x16xf32>
    %cst_27 = arith.constant dense<0.000000e+00> : vector<16x256xf32>
    %65 = tpu.matmul %64, %63, %cst_27 {dimension_numbers = #tpu.dot_dimension_numbers<[1], [0], [0], [1], [0, 0, 1, 1], [], []>} : vector<16x16xf32>, vector<16x256xf32>, vector<16x256xf32> -> vector<16x256xf32>
    %c0_28 = arith.constant 0 : index
    %c0_29 = arith.constant 0 : index
    %66 = vector.load %arg13[%c0_28, %c0_29] : memref<16x1xf32, #tpu.memory_space<vmem>>, vector<16x1xf32>
    %67 = vector.broadcast %66 : vector<16x1xf32> to vector<16x256xf32>
    %68 = arith.addf %65, %67 : vector<16x256xf32>
    %69 = arith.mulf %68, %68 : vector<16x256xf32>
    %cst_30 = arith.constant dense<0.000000e+00> : vector<256xf32>
    %70 = vector.multi_reduction <add>, %69, %cst_30 [0] : vector<16x256xf32> to vector<256xf32>
    %71 = vector.shape_cast %70 : vector<256xf32> to vector<1x256xf32>
    %72 = math.sqrt %71 : vector<1x256xf32>
    %cst_31 = arith.constant 1.000000e-10 : f32
    %73 = vector.broadcast %cst_31 : f32 to vector<1x256xf32>
    %74 = arith.addf %72, %73 : vector<1x256xf32>
    %75 = tpu.reciprocal %74 {approx = true} : vector<1x256xf32> -> vector<1x256xf32>
    %76 = vector.broadcast %75 : vector<1x256xf32> to vector<16x256xf32>
    %77 = arith.mulf %68, %76 : vector<16x256xf32>
    %78 = vector.extract_strided_slice %77 {offsets = [0, 0], sizes = [16, 128], strides = [1, 1]} : vector<16x256xf32> to vector<16x128xf32>
    %79 = vector.extract_strided_slice %77 {offsets = [0, 128], sizes = [16, 128], strides = [1, 1]} : vector<16x256xf32> to vector<16x128xf32>
    %80 = arith.subf %78, %79 : vector<16x128xf32>
    %81 = arith.mulf %80, %80 : vector<16x128xf32>
    %c0_32 = arith.constant 0 : index
    %c0_33 = arith.constant 0 : index
    %82 = vector.load %arg19[%c0_32, %c0_33] : memref<16x1xf32, #tpu.memory_space<vmem>>, vector<16x1xf32>
    %83 = vector.broadcast %82 : vector<16x1xf32> to vector<16x128xf32>
    %84 = arith.mulf %81, %83 : vector<16x128xf32>
    %85 = vector.extract_strided_slice %84 {offsets = [0, 0], sizes = [8, 128], strides = [1, 1]} : vector<16x128xf32> to vector<8x128xf32>
    %86 = arith.addf %61, %85 : vector<8x128xf32>
    %87 = vector.extract_strided_slice %84 {offsets = [8, 0], sizes = [8, 128], strides = [1, 1]} : vector<16x128xf32> to vector<8x128xf32>
    %88 = arith.addf %86, %87 : vector<8x128xf32>
    %cst_34 = arith.constant 0.000000e+00 : f32
    %89 = vector.broadcast %cst_34 : f32 to vector<16x256xf32>
    %90 = arith.maximumf %68, %89 : vector<16x256xf32>
    %c0_35 = arith.constant 0 : index
    %c0_36 = arith.constant 0 : index
    %91 = vector.load %arg8[%c0_35, %c0_36] : memref<16x16xf32, #tpu.memory_space<vmem>>, vector<16x16xf32>
    %cst_37 = arith.constant dense<0.000000e+00> : vector<16x256xf32>
    %92 = tpu.matmul %91, %90, %cst_37 {dimension_numbers = #tpu.dot_dimension_numbers<[1], [0], [0], [1], [0, 0, 1, 1], [], []>} : vector<16x16xf32>, vector<16x256xf32>, vector<16x256xf32> -> vector<16x256xf32>
    %c0_38 = arith.constant 0 : index
    %c0_39 = arith.constant 0 : index
    %93 = vector.load %arg14[%c0_38, %c0_39] : memref<16x1xf32, #tpu.memory_space<vmem>>, vector<16x1xf32>
    %94 = vector.broadcast %93 : vector<16x1xf32> to vector<16x256xf32>
    %95 = arith.addf %92, %94 : vector<16x256xf32>
    %96 = arith.mulf %95, %95 : vector<16x256xf32>
    %cst_40 = arith.constant dense<0.000000e+00> : vector<256xf32>
    %97 = vector.multi_reduction <add>, %96, %cst_40 [0] : vector<16x256xf32> to vector<256xf32>
    %98 = vector.shape_cast %97 : vector<256xf32> to vector<1x256xf32>
    %99 = math.sqrt %98 : vector<1x256xf32>
    %cst_41 = arith.constant 1.000000e-10 : f32
    %100 = vector.broadcast %cst_41 : f32 to vector<1x256xf32>
    %101 = arith.addf %99, %100 : vector<1x256xf32>
    %102 = tpu.reciprocal %101 {approx = true} : vector<1x256xf32> -> vector<1x256xf32>
    %103 = vector.broadcast %102 : vector<1x256xf32> to vector<16x256xf32>
    %104 = arith.mulf %95, %103 : vector<16x256xf32>
    %105 = vector.extract_strided_slice %104 {offsets = [0, 0], sizes = [16, 128], strides = [1, 1]} : vector<16x256xf32> to vector<16x128xf32>
    %106 = vector.extract_strided_slice %104 {offsets = [0, 128], sizes = [16, 128], strides = [1, 1]} : vector<16x256xf32> to vector<16x128xf32>
    %107 = arith.subf %105, %106 : vector<16x128xf32>
    %108 = arith.mulf %107, %107 : vector<16x128xf32>
    %c0_42 = arith.constant 0 : index
    %c0_43 = arith.constant 0 : index
    %109 = vector.load %arg20[%c0_42, %c0_43] : memref<16x1xf32, #tpu.memory_space<vmem>>, vector<16x1xf32>
    %110 = vector.broadcast %109 : vector<16x1xf32> to vector<16x128xf32>
    %111 = arith.mulf %108, %110 : vector<16x128xf32>
    %112 = vector.extract_strided_slice %111 {offsets = [0, 0], sizes = [8, 128], strides = [1, 1]} : vector<16x128xf32> to vector<8x128xf32>
    %113 = arith.addf %88, %112 : vector<8x128xf32>
    %114 = vector.extract_strided_slice %111 {offsets = [8, 0], sizes = [8, 128], strides = [1, 1]} : vector<16x128xf32> to vector<8x128xf32>
    %115 = arith.addf %113, %114 : vector<8x128xf32>
    %cst_44 = arith.constant 0.000000e+00 : f32
    %116 = vector.broadcast %cst_44 : f32 to vector<16x256xf32>
    %117 = arith.maximumf %95, %116 : vector<16x256xf32>
    %c0_45 = arith.constant 0 : index
    %c0_46 = arith.constant 0 : index
    %118 = vector.load %arg9[%c0_45, %c0_46] : memref<32x16xf32, #tpu.memory_space<vmem>>, vector<32x16xf32>
    %cst_47 = arith.constant dense<0.000000e+00> : vector<32x256xf32>
    %119 = tpu.matmul %118, %117, %cst_47 {dimension_numbers = #tpu.dot_dimension_numbers<[1], [0], [0], [1], [0, 0, 1, 1], [], []>} : vector<32x16xf32>, vector<16x256xf32>, vector<32x256xf32> -> vector<32x256xf32>
    %c0_48 = arith.constant 0 : index
    %c0_49 = arith.constant 0 : index
    %120 = vector.load %arg15[%c0_48, %c0_49] : memref<32x1xf32, #tpu.memory_space<vmem>>, vector<32x1xf32>
    %121 = vector.broadcast %120 : vector<32x1xf32> to vector<32x256xf32>
    %122 = arith.addf %119, %121 : vector<32x256xf32>
    %123 = arith.mulf %122, %122 : vector<32x256xf32>
    %cst_50 = arith.constant dense<0.000000e+00> : vector<256xf32>
    %124 = vector.multi_reduction <add>, %123, %cst_50 [0] : vector<32x256xf32> to vector<256xf32>
    %125 = vector.shape_cast %124 : vector<256xf32> to vector<1x256xf32>
    %126 = math.sqrt %125 : vector<1x256xf32>
    %cst_51 = arith.constant 1.000000e-10 : f32
    %127 = vector.broadcast %cst_51 : f32 to vector<1x256xf32>
    %128 = arith.addf %126, %127 : vector<1x256xf32>
    %129 = tpu.reciprocal %128 {approx = true} : vector<1x256xf32> -> vector<1x256xf32>
    %130 = vector.broadcast %129 : vector<1x256xf32> to vector<32x256xf32>
    %131 = arith.mulf %122, %130 : vector<32x256xf32>
    %132 = vector.extract_strided_slice %131 {offsets = [0, 0], sizes = [32, 128], strides = [1, 1]} : vector<32x256xf32> to vector<32x128xf32>
    %133 = vector.extract_strided_slice %131 {offsets = [0, 128], sizes = [32, 128], strides = [1, 1]} : vector<32x256xf32> to vector<32x128xf32>
    %134 = arith.subf %132, %133 : vector<32x128xf32>
    %135 = arith.mulf %134, %134 : vector<32x128xf32>
    %c0_52 = arith.constant 0 : index
    %c0_53 = arith.constant 0 : index
    %136 = vector.load %arg21[%c0_52, %c0_53] : memref<32x1xf32, #tpu.memory_space<vmem>>, vector<32x1xf32>
    %137 = vector.broadcast %136 : vector<32x1xf32> to vector<32x128xf32>
    %138 = arith.mulf %135, %137 : vector<32x128xf32>
    %139 = vector.extract_strided_slice %138 {offsets = [0, 0], sizes = [8, 128], strides = [1, 1]} : vector<32x128xf32> to vector<8x128xf32>
    %140 = arith.addf %115, %139 : vector<8x128xf32>
    %141 = vector.extract_strided_slice %138 {offsets = [8, 0], sizes = [8, 128], strides = [1, 1]} : vector<32x128xf32> to vector<8x128xf32>
    %142 = arith.addf %140, %141 : vector<8x128xf32>
    %143 = vector.extract_strided_slice %138 {offsets = [16, 0], sizes = [8, 128], strides = [1, 1]} : vector<32x128xf32> to vector<8x128xf32>
    %144 = arith.addf %142, %143 : vector<8x128xf32>
    %145 = vector.extract_strided_slice %138 {offsets = [24, 0], sizes = [8, 128], strides = [1, 1]} : vector<32x128xf32> to vector<8x128xf32>
    %146 = arith.addf %144, %145 : vector<8x128xf32>
    %cst_54 = arith.constant 0.000000e+00 : f32
    %147 = vector.broadcast %cst_54 : f32 to vector<32x256xf32>
    %148 = arith.maximumf %122, %147 : vector<32x256xf32>
    %c0_55 = arith.constant 0 : index
    %c0_56 = arith.constant 0 : index
    %149 = vector.load %arg10[%c0_55, %c0_56] : memref<32x32xf32, #tpu.memory_space<vmem>>, vector<32x32xf32>
    %cst_57 = arith.constant dense<0.000000e+00> : vector<32x256xf32>
    %150 = tpu.matmul %149, %148, %cst_57 {dimension_numbers = #tpu.dot_dimension_numbers<[1], [0], [0], [1], [0, 0, 1, 1], [], []>} : vector<32x32xf32>, vector<32x256xf32>, vector<32x256xf32> -> vector<32x256xf32>
    %c0_58 = arith.constant 0 : index
    %c0_59 = arith.constant 0 : index
    %151 = vector.load %arg16[%c0_58, %c0_59] : memref<32x1xf32, #tpu.memory_space<vmem>>, vector<32x1xf32>
    %152 = vector.broadcast %151 : vector<32x1xf32> to vector<32x256xf32>
    %153 = arith.addf %150, %152 : vector<32x256xf32>
    %154 = arith.mulf %153, %153 : vector<32x256xf32>
    %cst_60 = arith.constant dense<0.000000e+00> : vector<256xf32>
    %155 = vector.multi_reduction <add>, %154, %cst_60 [0] : vector<32x256xf32> to vector<256xf32>
    %156 = vector.shape_cast %155 : vector<256xf32> to vector<1x256xf32>
    %157 = math.sqrt %156 : vector<1x256xf32>
    %cst_61 = arith.constant 1.000000e-10 : f32
    %158 = vector.broadcast %cst_61 : f32 to vector<1x256xf32>
    %159 = arith.addf %157, %158 : vector<1x256xf32>
    %160 = tpu.reciprocal %159 {approx = true} : vector<1x256xf32> -> vector<1x256xf32>
    %161 = vector.broadcast %160 : vector<1x256xf32> to vector<32x256xf32>
    %162 = arith.mulf %153, %161 : vector<32x256xf32>
    %163 = vector.extract_strided_slice %162 {offsets = [0, 0], sizes = [32, 128], strides = [1, 1]} : vector<32x256xf32> to vector<32x128xf32>
    %164 = vector.extract_strided_slice %162 {offsets = [0, 128], sizes = [32, 128], strides = [1, 1]} : vector<32x256xf32> to vector<32x128xf32>
    %165 = arith.subf %163, %164 : vector<32x128xf32>
    %166 = arith.mulf %165, %165 : vector<32x128xf32>
    %c0_62 = arith.constant 0 : index
    %c0_63 = arith.constant 0 : index
    %167 = vector.load %arg22[%c0_62, %c0_63] : memref<32x1xf32, #tpu.memory_space<vmem>>, vector<32x1xf32>
    %168 = vector.broadcast %167 : vector<32x1xf32> to vector<32x128xf32>
    %169 = arith.mulf %166, %168 : vector<32x128xf32>
    %170 = vector.extract_strided_slice %169 {offsets = [0, 0], sizes = [8, 128], strides = [1, 1]} : vector<32x128xf32> to vector<8x128xf32>
    %171 = arith.addf %146, %170 : vector<8x128xf32>
    %172 = vector.extract_strided_slice %169 {offsets = [8, 0], sizes = [8, 128], strides = [1, 1]} : vector<32x128xf32> to vector<8x128xf32>
    %173 = arith.addf %171, %172 : vector<8x128xf32>
    %174 = vector.extract_strided_slice %169 {offsets = [16, 0], sizes = [8, 128], strides = [1, 1]} : vector<32x128xf32> to vector<8x128xf32>
    %175 = arith.addf %173, %174 : vector<8x128xf32>
    %176 = vector.extract_strided_slice %169 {offsets = [24, 0], sizes = [8, 128], strides = [1, 1]} : vector<32x128xf32> to vector<8x128xf32>
    %177 = arith.addf %175, %176 : vector<8x128xf32>
    %c1_i32 = arith.constant 1 : i32
    %cst_64 = arith.constant dense<0.000000e+00> : vector<128xf32>
    %178 = vector.multi_reduction <add>, %177, %cst_64 [0] : vector<8x128xf32> to vector<128xf32>
    %179 = vector.shape_cast %178 : vector<128xf32> to vector<1x128xf32>
    %cst_65 = arith.constant dense<0.000000e+00> : vector<1xf32>
    %180 = vector.multi_reduction <add>, %179, %cst_65 [1] : vector<1x128xf32> to vector<1xf32>
    %181 = vector.shape_cast %180 : vector<1xf32> to vector<1x1xf32>
    %c0_66 = arith.constant 0 : index
    %c0_67 = arith.constant 0 : index
    %182 = vector.load %arg24[%c0_66, %c0_67] : memref<1x1xf32, #tpu.memory_space<vmem>>, vector<1x1xf32>
    %183 = arith.addf %182, %181 : vector<1x1xf32>
    %c0_68 = arith.constant 0 : index
    %c0_69 = arith.constant 0 : index
    %184 = vector.load %arg24[%c0_68, %c0_69] : memref<1x1xf32, #tpu.memory_space<vmem>>, vector<1x1xf32>
    tpu.vector_store %arg24[%c0_68, %c0_69], %183 {strides = array<i32>} : memref<1x1xf32, #tpu.memory_space<vmem>>, vector<1x1xf32>,
    %c0_i32_70 = arith.constant 0 : i32
    %185 = arith.cmpi eq, %arg2, %c0_i32_70 : i32
    %186 = arith.extui %185 : i1 to i32
    %c0_i32_71 = arith.constant 0 : i32
    %187 = arith.cmpi ne, %186, %c0_i32_71 : i32
    scf.if %187 {
      %c0_72 = arith.constant 0 : index
      %c0_73 = arith.constant 0 : index
      %188 = vector.load %arg24[%c0_72, %c0_73] : memref<1x1xf32, #tpu.memory_space<vmem>>, vector<1x1xf32>
      %cst_74 = arith.constant 3.906250e-03 : f32
      %189 = vector.broadcast %cst_74 : f32 to vector<1x1xf32>
      %190 = arith.mulf %188, %189 : vector<1x1xf32>
      %191 = vector.shape_cast %190 : vector<1x1xf32> to vector<1x1x1x1xf32>
      %c0_75 = arith.constant 0 : index
      %c0_76 = arith.constant 0 : index
      %c0_77 = arith.constant 0 : index
      %c0_78 = arith.constant 0 : index
      %192 = vector.load %arg23[%c0_75, %c0_76, %c0_77, %c0_78] : memref<1x1x1x1xf32, #tpu.memory_space<vmem>>, vector<1x1x1x1xf32>
      tpu.vector_store %arg23[%c0_75, %c0_76, %c0_77, %c0_78], %191 {strides = array<i32>} : memref<1x1x1x1xf32, #tpu.memory_space<vmem>>, vector<1x1x1x1xf32>,
    } else {
    }
    return
  }
  func.func @transform_0(%arg0: i32, %arg1: i32, %arg2: i32) -> (i32, i32, i32) {
    %c1_i32 = arith.constant 1 : i32
    %0 = arith.muli %arg1, %c1_i32 : i32
    %1 = arith.addi %0, %arg2 : i32
    %c0_i32 = arith.constant 0 : i32
    %c0_i32_0 = arith.constant 0 : i32
    return %arg0, %c0_i32, %1 : i32, i32, i32
  }
  func.func @transform_1(%arg0: i32, %arg1: i32, %arg2: i32) -> (i32, i32, i32) {
    %c1_i32 = arith.constant 1 : i32
    %0 = arith.muli %arg1, %c1_i32 : i32
    %1 = arith.addi %0, %arg2 : i32
    %c0_i32 = arith.constant 0 : i32
    %c0_i32_0 = arith.constant 0 : i32
    return %arg0, %c0_i32, %1 : i32, i32, i32
  }
  func.func @transform_2(%arg0: i32, %arg1: i32, %arg2: i32) -> (i32, i32) {
    %c0_i32 = arith.constant 0 : i32
    %c0_i32_0 = arith.constant 0 : i32
    %c0_i32_1 = arith.constant 0 : i32
    return %c0_i32, %c0_i32_0 : i32, i32
  }
  func.func @transform_3(%arg0: i32, %arg1: i32, %arg2: i32) -> (i32, i32) {
    %c0_i32 = arith.constant 0 : i32
    %c0_i32_0 = arith.constant 0 : i32
    %c0_i32_1 = arith.constant 0 : i32
    return %c0_i32, %c0_i32_0 : i32, i32
  }
  func.func @transform_4(%arg0: i32, %arg1: i32, %arg2: i32) -> (i32, i32) {
    %c0_i32 = arith.constant 0 : i32
    %c0_i32_0 = arith.constant 0 : i32
    %c0_i32_1 = arith.constant 0 : i32
    return %c0_i32, %c0_i32_0 : i32, i32
  }
  func.func @transform_5(%arg0: i32, %arg1: i32, %arg2: i32) -> (i32, i32) {
    %c0_i32 = arith.constant 0 : i32
    %c0_i32_0 = arith.constant 0 : i32
    %c0_i32_1 = arith.constant 0 : i32
    return %c0_i32, %c0_i32_0 : i32, i32
  }
  func.func @transform_6(%arg0: i32, %arg1: i32, %arg2: i32) -> (i32, i32) {
    %c0_i32 = arith.constant 0 : i32
    %c0_i32_0 = arith.constant 0 : i32
    %c0_i32_1 = arith.constant 0 : i32
    return %c0_i32, %c0_i32_0 : i32, i32
  }
  func.func @transform_7(%arg0: i32, %arg1: i32, %arg2: i32) -> (i32, i32) {
    %c0_i32 = arith.constant 0 : i32
    %c0_i32_0 = arith.constant 0 : i32
    %c0_i32_1 = arith.constant 0 : i32
    return %c0_i32, %c0_i32_0 : i32, i32
  }
  func.func @transform_8(%arg0: i32, %arg1: i32, %arg2: i32) -> (i32, i32) {
    %c0_i32 = arith.constant 0 : i32
    %c0_i32_0 = arith.constant 0 : i32
    %c0_i32_1 = arith.constant 0 : i32
    return %c0_i32, %c0_i32_0 : i32, i32
  }
  func.func @transform_9(%arg0: i32, %arg1: i32, %arg2: i32) -> (i32, i32) {
    %c0_i32 = arith.constant 0 : i32
    %c0_i32_0 = arith.constant 0 : i32
    %c0_i32_1 = arith.constant 0 : i32
    return %c0_i32, %c0_i32_0 : i32, i32
  }
  func.func @transform_10(%arg0: i32, %arg1: i32, %arg2: i32) -> (i32, i32) {
    %c0_i32 = arith.constant 0 : i32
    %c0_i32_0 = arith.constant 0 : i32
    %c0_i32_1 = arith.constant 0 : i32
    return %c0_i32, %c0_i32_0 : i32, i32
  }
  func.func @transform_11(%arg0: i32, %arg1: i32, %arg2: i32) -> (i32, i32) {
    %c0_i32 = arith.constant 0 : i32
    %c0_i32_0 = arith.constant 0 : i32
    %c0_i32_1 = arith.constant 0 : i32
    return %c0_i32, %c0_i32_0 : i32, i32
  }
  func.func @transform_12(%arg0: i32, %arg1: i32, %arg2: i32) -> (i32, i32) {
    %c0_i32 = arith.constant 0 : i32
    %c0_i32_0 = arith.constant 0 : i32
    %c0_i32_1 = arith.constant 0 : i32
    return %c0_i32, %c0_i32_0 : i32, i32
  }
  func.func @transform_13(%arg0: i32, %arg1: i32, %arg2: i32) -> (i32, i32) {
    %c0_i32 = arith.constant 0 : i32
    %c0_i32_0 = arith.constant 0 : i32
    %c0_i32_1 = arith.constant 0 : i32
    return %c0_i32, %c0_i32_0 : i32, i32
  }
  func.func @transform_14(%arg0: i32, %arg1: i32, %arg2: i32) -> (i32, i32) {
    %c0_i32 = arith.constant 0 : i32
    %c0_i32_0 = arith.constant 0 : i32
    %c0_i32_1 = arith.constant 0 : i32
    return %c0_i32, %c0_i32_0 : i32, i32
  }
  func.func @transform_15(%arg0: i32, %arg1: i32, %arg2: i32) -> (i32, i32) {
    %c0_i32 = arith.constant 0 : i32
    %c0_i32_0 = arith.constant 0 : i32
    %c0_i32_1 = arith.constant 0 : i32
    return %c0_i32, %c0_i32_0 : i32, i32
  }
  func.func @transform_16(%arg0: i32, %arg1: i32, %arg2: i32) -> (i32, i32) {
    %c0_i32 = arith.constant 0 : i32
    %c0_i32_0 = arith.constant 0 : i32
    %c0_i32_1 = arith.constant 0 : i32
    return %c0_i32, %c0_i32_0 : i32, i32
  }
  func.func @transform_17(%arg0: i32, %arg1: i32, %arg2: i32) -> (i32, i32) {
    %c0_i32 = arith.constant 0 : i32
    %c0_i32_0 = arith.constant 0 : i32
    %c0_i32_1 = arith.constant 0 : i32
    return %c0_i32, %c0_i32_0 : i32, i32
  }
  func.func @transform_18(%arg0: i32, %arg1: i32, %arg2: i32) -> (i32, i32) {
    %c0_i32 = arith.constant 0 : i32
    %c0_i32_0 = arith.constant 0 : i32
    %c0_i32_1 = arith.constant 0 : i32
    return %c0_i32, %c0_i32_0 : i32, i32
  }
  func.func @transform_19(%arg0: i32, %arg1: i32, %arg2: i32) -> (i32, i32) {
    %c0_i32 = arith.constant 0 : i32
    %c0_i32_0 = arith.constant 0 : i32
    %c0_i32_1 = arith.constant 0 : i32
    return %c0_i32, %c0_i32_0 : i32, i32
  }
  func.func @transform_20(%arg0: i32, %arg1: i32, %arg2: i32) -> (i32, i32, i32, i32) {
    %c0_i32 = arith.constant 0 : i32
    %c0_i32_0 = arith.constant 0 : i32
    %c0_i32_1 = arith.constant 0 : i32
    return %arg0, %arg1, %c0_i32, %c0_i32_0 : i32, i32, i32, i32
  }
}

</mosaic_0001>

<bundles_post_ra>
// kernel: tpu_custom_call.1
= control target key start
LH: loop header
LB: loop body
LE: loop exit
PB: predicated region body
PF: predicated region fallthrough
CT: control target
= control target key end

     0   :  { %s2199_s22 = smov 0   ;;  %s2201_s23 = smov 0   ;;  %s2582_s0 = inlined_call_operand.vmem [shape: f32[2,4,256], index: 0, kind: input, shape index: {}]   ;;  %s2583_s1 = inlined_call_operand.vmem [shape: f32[2,4,256], index: 1, kind: input, shape index: {}]   ;;  %s2584_s2 = inlined_call_operand.vmem [shape: f32[8,4], index: 2, kind: input, shape index: {}]   ;;  %s2585_s3 = inlined_call_operand.vmem [shape: f32[16,8], index: 3, kind: input, shape index: {}]   ;;  %s2586_s4 = inlined_call_operand.vmem [shape: f32[16,16], index: 4, kind: input, shape index: {}]   ;;  %s2587_s5 = inlined_call_operand.vmem [shape: f32[16,16], index: 5, kind: input, shape index: {}]   ;;  %s2588_s6 = inlined_call_operand.vmem [shape: f32[32,16], index: 6, kind: input, shape index: {}]   ;;  %s2589_s7 = inlined_call_operand.vmem [shape: f32[32,32], index: 7, kind: input, shape index: {}]   ;;  %s2590_s8 = inlined_call_operand.vmem [shape: f32[8,1], index: 8, kind: input, shape index: {}]   ;;  %s2591_s9 = inlined_call_operand.vmem [shape: f32[16,1], index: 9, kind: input, shape index: {}]   ;;  %s2592_s10 = inlined_call_operand.vmem [shape: f32[16,1], index: 10, kind: input, shape index: {}]   ;;  %s2593_s11 = inlined_call_operand.vmem [shape: f32[16,1], index: 11, kind: input, shape index: {}]   ;;  %s2594_s12 = inlined_call_operand.vmem [shape: f32[32,1], index: 12, kind: input, shape index: {}]   ;;  %s2595_s13 = inlined_call_operand.vmem [shape: f32[32,1], index: 13, kind: input, shape index: {}]   ;;  %s2596_s14 = inlined_call_operand.vmem [shape: f32[8,1], index: 14, kind: input, shape index: {}]   ;;  %s2597_s15 = inlined_call_operand.vmem [shape: f32[16,1], index: 15, kind: input, shape index: {}]   ;;  %s2598_s16 = inlined_call_operand.vmem [shape: f32[16,1], index: 16, kind: input, shape index: {}]   ;;  %s2599_s17 = inlined_call_operand.vmem [shape: f32[16,1], index: 17, kind: input, shape index: {}]   ;;  %s2600_s18 = inlined_call_operand.vmem [shape: f32[32,1], index: 18, kind: input, shape index: {}]   ;;  %s2601_s19 = inlined_call_operand.vmem [shape: f32[32,1], index: 19, kind: input, shape index: {}]   ;;  %s2602_s20 = inlined_call_operand.vmem [shape: f32[2,2,1,1], index: 20, kind: output, shape index: {}]  }
   0x1   :  { %2608 = sst [smem:[#allocation8_spill]] %s2582_s0  ;;  %s2203_s24 = smov 0  }
   0x2   :  { %2609 = sst [smem:[#allocation9_spill]] %s2583_s1  ;;  %s2197_s1 = smov 0  }
   0x3   :  { %2610 = sst [smem:[#allocation10_spill]] %s2584_s2  ;;  %s2205_s2 = smov 0  }
   0x4   :  { %2611 = sst [smem:[#allocation11_spill]] %s2585_s3 }
   0x5   :  { %2612 = sst [smem:[#allocation12_spill]] %s2586_s4 }
   0x6   :  { %2613 = sst [smem:[#allocation13_spill]] %s2590_s8 }
   0x7   :  { %2614 = sst [smem:[#allocation14_spill]] %s2602_s20 }
   0x8 LB: > { %2615 = sst [smem:[#allocation3_spill]] %s2080_s23  ;;  %s45_s25 = sadd.s32 1, %s2080_s23  ;;  %s2088_s2 = sphi %s2205_s2, %s30_s2   ;;  %s2084_s24 = sphi %s2203_s24, %s2632_s24   ;;  %s2080_s23 = sphi %s2201_s23, %s2631_s23   ;;  %s2076_s22 = sphi %s2199_s22, %s2630_s22   ;;  %s2072_s1 = sphi %s2197_s1, %s2629_s1  }
   0x9   : > { %2616 = sst [smem:[#allocation4_spill]] %s2084_s24  ;;  %s49_s3 = sadd.s32 1, %s2084_s24 }
   0xa   : > { %2617 = sst [smem:[#allocation5_spill]] %s2088_s2  ;;  %p47_p0 = scmp.ge.s32.totalorder %s45_s25, 2 }
   0xb   : > { %p1913_p1 = scmp.ge.s32.totalorder %s2088_s2, 1  ;;  %p611_p2 = scmp.lt.s32.totalorder %s2088_s2, 5 }
   0xc   : > { %s2634_s25 = smov (%p47_p0, %s45_s25), 0  ;;  %s2636_s3 = smov (!%p47_p0, %s49_s3), %s2084_s24 }
   0xd   : > { %2618 = sst [smem:[#allocation6_spill]] %s2634_s25  ;;  %p612_p3 = pnand %p1913_p1, %p611_p2 }
   0xe   : > { %p51_p4 = scmp.ge.s32.totalorder %s2636_s3, 2  ;;  %p685_p5 = scmp.lt.s32.totalorder (!%p612_p3), %s2076_s22, 1  ;;  %v2090_v0 = vmov (!%p612_p3), 0.0   ;;  %v2091_v2 = vmov (!%p612_p3), 0   ;;  %v856_v3 = vld [vmem:[%s2591_s9] sm:$0xff] (!%p612_p3)  ;;  %vm730_vm0 = vcmask (!%p612_p3), 1043456  }
   0xf   : > { %615 = sbr.rel (%p612_p3) target bundleno = 1621 (0x655), region = 100  ;;  %p687_p6 = scmp.lt.s32.totalorder (!%p612_p3), %s2072_s1, 1  ;;  %801 = vmatprep.mubr.f32.mxu0 (!%p612_p3), %v2090_v0  ;;  %939 = vmatprep.mubr.f32.mxu1 (!%p612_p3), %v2090_v0  ;;  %v857_v4 = vld [vmem:[%s2591_s9 + $0x8] sm:$0xff] (!%p612_p3)  ;;  %vm726_vm1 = vcmask (!%p612_p3), 31744   ;;  %v1018_v9 = vld [vmem:[%s2592_s10] sm:$0xff] (!%p612_p3)  ;;  %v1346_v14 = vld [vmem:[%s2594_s12 + $0x18] sm:$0xff] (!%p612_p3) }
  0x10   : > { %s2638_s3 = smov (%p51_p4, %s2636_s3), 0  ;;  %s2620_s8 = sld [smem:[#allocation13_spill]] (!%p612_p3)  ;;  %2000 = vset.pattern.permute.xlu0 (!%p612_p3), %v2091_v2  ;;  %2001 = vset.pattern.permute.xlu1 (!%p612_p3), %v2091_v2  ;;  %v1019_v8 = vld [vmem:[%s2592_s10 + $0x8] sm:$0xff] (!%p612_p3)  ;;  %v1180_v11 = vld [vmem:[%s2593_s11] sm:$0xff] (!%p612_p3)  ;;  %v1345_v15 = vld [vmem:[%s2594_s12 + $0x10] sm:$0xff] (!%p612_p3)  ;;  %vm868_vm2 = vcmask (!%p612_p3), 64512  }
  0x11   : > { %2619 = sst [smem:[#allocation7_spill]] %s2638_s3  ;;  %s2621_s3 = sld [smem:[#allocation9_spill]] (!%p612_p3)  ;;  %865 = vperm.xlu1 (!%p612_p3), %2001, %v857_v4   ;;  %v1181_v10 = vld [vmem:[%s2593_s11 + $0x8] sm:$0xff] (!%p612_p3)  ;;  %v1343_v13 = vld [vmem:[%s2594_s12] sm:$0xff] (!%p612_p3)  ;;  %v1575_v18 = vld [vmem:[%s2595_s13 + $0x18] sm:$0xff] (!%p612_p3)  ;;  %vm1030_vm7 = vcmask (!%p612_p3), 130048  }
  0x12   : > { %s2623_s29 = sld [smem:[#allocation10_spill]] (!%p612_p3)  ;;  %v1344_v12 = vld [vmem:[%s2594_s12 + $0x8] sm:$0xff] (!%p612_p3)  ;;  %v1572_v17 = vld [vmem:[%s2595_s13] sm:$0xff] (!%p612_p3)  ;;  %v1574_v19 = vld [vmem:[%s2595_s13 + $0x10] sm:$0xff] (!%p612_p3)  ;;  %s2627_s21 = sld [smem:[#allocation14_spill]] (!%p612_p3) }
  0x13   : > { %v1573_v16 = vld [vmem:[%s2595_s13 + $0x8] sm:$0xff] (!%p612_p3)  ;;  %v996_v20 = vld [vmem:[%s2597_s15] sm:$0xff] (!%p612_p3)  ;;  %v1530_v25 = vld [vmem:[%s2600_s18 + $0x10] sm:$0xff] (!%p612_p3) }
  0x14   : > { %v844_v21 = vld [vmem:[%s2596_s14] sm:$0xff] (!%p612_p3)  ;;  %v1760_v27 = vld [vmem:[%s2601_s19 + $0x10] sm:$0xff] (!%p612_p3)  ;;  %v997_v28 = vld [vmem:[%s2597_s15 + $0x8] sm:$0xff] (!%p612_p3) }
  0x15   : > { %1022 = vperm.xlu1 (!%p612_p3), %2001, %v1018_v9   ;;  %v1158_v22 = vld [vmem:[%s2598_s16] sm:$0xff] (!%p612_p3)  ;;  %v1159_v29 = vld [vmem:[%s2598_s16 + $0x8] sm:$0xff] (!%p612_p3)  ;;  %v1531_v32 = vld [vmem:[%s2600_s18 + $0x18] sm:$0xff] (!%p612_p3) }
  0x16   : > { %v720_v1 = vld [vmem:[%s2620_s8] sm:$0xff]  ;;  %s2640_s22 = smov (!%p685_p5, %s2076_s22), 1  ;;  %s2642_s1 = smov (!%p687_p6, %s2072_s1), 1  ;;  %v1320_v30 = vld [vmem:[%s2599_s17 + $0x8] sm:$0xff]  ;;  %v1761_v34 = vld [vmem:[%s2601_s19 + $0x18] sm:$0xff] }
  0x17   : > { %723 = vperm.xlu0 %2000, %v720_v1   ;;  %s1914_s28 = sshll.u32 %s2640_s22, 1  ;;  %s2622_s22 = sld [smem:[#allocation8_spill]]  ;;  %v1319_v23 = vld [vmem:[%s2599_s17] sm:$0xff]  ;;  %v1529_v31 = vld [vmem:[%s2600_s18 + $0x8] sm:$0xff] }
  0x18   : > { %s2235_s30 = sadd.s32 %s1914_s28, %s2642_s1  ;;  %v719_v5 = vld [vmem:[%s2623_s29] sm:$0xff]  ;;  %v1759_v33 = vld [vmem:[%s2601_s19 + $0x8] sm:$0xff] }
  0x19   : > { %s1915_s0 = sshll.u32 %s2235_s30, 2  ;;  %1184 = vperm.xlu1 %2001, %v1180_v11   ;;  %v1528_v24 = vld [vmem:[%s2600_s18] sm:$0xff]  ;;  %s710_s26 = scalar_lea.vmem %s2627_s21, %s2235_s30 }
  0x1a   : > { %s702_s25 = scalar_lea.vmem %s2621_s3, %s1915_s0  ;;  %v1758_v26 = vld [vmem:[%s2601_s19] sm:$0xff] }
  0x1b   : > { %860 = vperm.xlu0 %2000, %v856_v3   ;;  %v718_v6 = vld [vmem:[%s702_s25] sm:$0xf]  ;;  %s2624_s25 = sld [smem:[#allocation11_spill]] }
  0x1c   : > { %1919 = vmatprep.subr.msk.mxu0 %vm730_vm0, %v718_v6 }
  0x1d   : > { %s692_s2 = scalar_lea.vmem %s2622_s22, %s1915_s0  ;;  %1349 = vperm.xlu1 %2001, %v1343_v13   ;;  %s2625_s22 = sld [smem:[#allocation12_spill]] }
  0x1e   : > { %v717_v7 = vld [vmem:[%s692_s2] sm:$0xf] }
  0x1f   : > { %1920 = vmatpush1.msk.msra.mxu0 %vm730_vm0, %v717_v7  ;;  %1027 = vperm.xlu0 %2000, %v1019_v8  }
  0x20   : > { %1921 = vmatmul.mubr.msk.f32.vlgmr.msra.gmra.mrb[0].mxu0 %vm726_vm1, %v719_v5 }
  0x21   : > { %1101 = vmatprep.mubr.f32.mxu0 %v2090_v0  ;;  %1359 = vperm.xlu1 %2001, %v1345_v15   ;;  %v854_v45 = vld [vmem:[%s2624_s25] sm:$0xff]  ;;  %v855_v50 = vld [vmem:[%s2624_s25 + $0x8] sm:$0xff] }
  0x23   : > { %1189 = vperm.xlu0 %2000, %v1181_v10   ;;  %s2626_s4 = smov %s2625_s22 }
  0x25   : > { %1578 = vperm.xlu1 %2001, %v1572_v17  }
  0x27   : > { %1354 = vperm.xlu0 %2000, %v1344_v12  }
  0x29   : > { %1588 = vperm.xlu1 %2001, %v1574_v19  }
  0x2b   : > { %1364 = vperm.xlu0 %2000, %v1346_v14  }
  0x2d   : > { %847 = vperm.xlu1 %2001, %v844_v21  }
  0x2f   : > { %1583 = vperm.xlu0 %2000, %v1573_v16  }
  0x31   : > { %1005 = vperm.xlu1 %2001, %v997_v28  }
  0x33   : > { %1593 = vperm.xlu0 %2000, %v1575_v18  }
  0x35   : > { %1167 = vperm.xlu1 %2001, %v1159_v29  }
  0x37   : > { %1000 = vperm.xlu0 %2000, %v996_v20  }
  0x39   : > { %1328 = vperm.xlu1 %2001, %v1320_v30  }
  0x3b   : > { %1162 = vperm.xlu0 %2000, %v1158_v22  }
  0x3d   : > { %1539 = vperm.xlu1 %2001, %v1529_v31  }
  0x3f   : > { %1323 = vperm.xlu0 %2000, %v1319_v23  }
  0x41   : > { %1549 = vperm.xlu1 %2001, %v1531_v32  }
  0x43   : > { %1534 = vperm.xlu0 %2000, %v1528_v24  }
  0x45   : > { %1769 = vperm.xlu1 %2001, %v1759_v33  }
  0x47   : > { %1544 = vperm.xlu0 %2000, %v1530_v25  }
  0x49   : > { %1779 = vperm.xlu1 %2001, %v1761_v34  }
  0x4b   : > { %1764 = vperm.xlu0 %2000, %v1758_v26  }
  0x4f   : > { %1774 = vperm.xlu0 %2000, %v1760_v27  }
  0x90   : > { %v866_v16 = vpop.permute.xlu1 %865 }
  0x96   : > { %v724_v35 = vpop.permute.xlu0 %723 }
  0x9a   : > { %v861_v14 = vpop.permute.xlu0 %860 }
  0xf3   : > { %v803_v36 = vpop.f32.mrb[0].mxu0 }
  0xf4   : > { %v804_v37 = vadd.f32 %v803_v36, %v724_v35  ;;  %v805_v38 = vpop.f32.mrb[1].mxu0 }
  0xf5   : > { %v806_v39 = vadd.f32 %v805_v38, %v724_v35 }
  0xf6   : > { %v808_v40 = vmul.f32 %v804_v37, %v804_v37  ;;  %v852_v44 = vmax.f32 %v804_v37, 0.0 }
  0xf7   : > { %v809_v41 = vmul.f32 %v806_v39, %v806_v39  ;;  %v853_v42 = vmax.f32 %v806_v39, 0.0 }
  0xf8   : > { %v810_v43 = vrot.slane %v808_v40, 4 }
  0xf9   : > { %v816_v46 = vrot.slane %v809_v41, 4  ;;  %875 = vmatprep.subr.mxu1 %v853_v42  ;;  %v1017_v42 = vld [vmem:[%s2626_s4 + $0x8] sm:$0xff] }
  0xfa   : > { %v811_v47 = vadd.f32 %v810_v43, %v808_v40  ;;  %876 = vmatpush1.msra.mxu1 %v852_v44  ;;  %v1023_v44 = vpop.permute.xlu1 %1022 }
  0xfb   : > { %v817_v48 = vadd.f32 %v816_v46, %v809_v41  ;;  %1922 = vmatmul.mubr.msk.f32.vlgmr.msra.gmra.mrb[0].mxu1 %vm868_vm2, %v854_v45 }
  0xfc   : > { %v812_v49 = vrot.slane %v811_v47, 2  ;;  %945 = vmatprep.mubr.f32.mxu1 %v2090_v0 }
  0xfd   : > { %v818_v51 = vrot.slane %v817_v48, 2 }
  0xfe   : > { %v813_v52 = vadd.f32 %v812_v49, %v811_v47  ;;  %v1028_v47 = vpop.permute.xlu0 %1027 }
  0xff   : > { %v819_v53 = vadd.f32 %v818_v51, %v817_v48  ;;  %1923 = vmatmul.mubr.msk.f32.gmra.mrb[2].mxu1 %vm868_vm2, %v855_v50  ;;  %v2372_v50 = vpop.permute.xlu1 %1184 }
 0x100   : > { %v814_v54 = vrot.slane %v813_v52, 1  ;;  %1262 = vmatprep.mubr.f32.mxu1 %v2090_v0 }
 0x101   : > { %v820_v55 = vrot.slane %v819_v53, 1 }
 0x102   : > { %v815_v56 = vadd.f32 %v814_v54, %v813_v52  ;;  %v2374_v51 = vpop.permute.xlu0 %1189 }
 0x103   : > { %v821_v57 = vadd.f32 %v820_v55, %v819_v53  ;;  %v2376_v52 = vpop.permute.xlu1 %1349 }
 0x104   : > { %2002 = vrsqrt.f32 %v815_v56  ;;  %vm824_vm3 = vcmp.eq.f32.partialorder %v815_v56, inf  ;;  %v827_v61 = vand.u32 2147483648, %v815_v56  ;;  %vm826_vm4 = vcmp.eq.f32.partialorder %v815_v56, 0.0 }
 0x105   : > { %2004 = vrsqrt.f32 %v821_v57  ;;  %vm831_vm5 = vcmp.eq.f32.partialorder %v821_v57, inf  ;;  %v834_v1 = vand.u32 2147483648, %v821_v57  ;;  %vm833_vm6 = vcmp.eq.f32.partialorder %v821_v57, 0.0 }
 0x106   : > { %v2378_v54 = vpop.permute.xlu0 %1354 }
 0x10e   : > { %v2003_v58 = vpop.eup %2002 }
 0x10f   : > { %v2005_v59 = vpop.eup %2004  ;;  %v823_v60 = vmul.f32 %v2003_v58, %v815_v56 }
 0x110   : > { %v830_v62 = vmul.f32 %v2005_v59, %v821_v57 }
 0x111   : > { %v825_v63 = vsel %vm824_vm3, %v815_v56, %v823_v60 }
 0x112   : > { %v828_v2 = vsel %vm826_vm4, %v827_v61, %v825_v63  ;;  %v832_v3 = vsel %vm831_vm5, %v821_v57, %v830_v62  ;;  %v2380_v61 = vpop.permute.xlu1 %1359  ;;  %vm1596_vm4 = vcmask 261120  }
 0x113   : > { %v835_v4 = vsel %vm833_vm6, %v834_v1, %v832_v3  ;;  %v836_v5 = vadd.f32 1e-10, %v828_v2  ;;  %v2382_v3 = vpop.permute.xlu0 %1364 }
 0x114   : > { %v837_v6 = vadd.f32 1e-10, %v835_v4 }
 0x115   : > { %2006 = vrcp.f32 %v836_v5 }
 0x116   : > { %2008 = vrcp.f32 %v837_v6  ;;  %v2384_v5 = vpop.permute.xlu1 %1578 }
 0x117   : > { %v2386_v6 = vpop.permute.xlu0 %1583 }
 0x11f   : > { %v2007_v7 = vpop.eup %2006 }
 0x120   : > { %v2009_v8 = vpop.eup %2008  ;;  %v840_v9 = vmul.f32 %v2007_v7, %v804_v37  ;;  %v1016_v37 = vld [vmem:[%s2625_s22] sm:$0xff]  ;;  %v2388_v7 = vpop.permute.xlu1 %1588 }
 0x121   : > { %v841_v10 = vmul.f32 %v2009_v8, %v806_v39 }
 0x123   : > { %v2340_v11 = vsub.f32 %v840_v9, %v841_v10  ;;  %v2390_v10 = vpop.permute.xlu0 %1593 }
 0x1ce   : > { %v941_v12 = vpop.f32.mrb[0].mxu1 }
 0x1cf   : > { %v943_v13 = vpop.f32.mrb[1].mxu1  ;;  %v2342_v15 = vadd.f32 %v941_v12, %v861_v14 }
 0x1d0   : > { %v2344_v17 = vadd.f32 %v943_v13, %v861_v14 }
 0x1d1   : > { %v952_v22 = vmul.f32 %v2342_v15, %v2342_v15  ;;  %v1012_v23 = vmax.f32 %v2342_v15, 0.0 }
 0x1d2   : > { %v947_v18 = vpop.f32.mrb[2].mxu1  ;;  %v953_v26 = vmul.f32 %v2344_v17, %v2344_v17  ;;  %v1013_v27 = vmax.f32 %v2344_v17, 0.0 }
 0x1d3   : > { %v2346_v19 = vadd.f32 %v947_v18, %v866_v16  ;;  %v949_v20 = vpop.f32.mrb[3].mxu1  ;;  %v843_v18 = vmul.f32 %v2340_v11, %v2340_v11 }
 0x1d4   : > { %v2348_v21 = vadd.f32 %v949_v20, %v866_v16 }
 0x1d5   : > { %v954_v24 = vmul.f32 %v2346_v19, %v2346_v19  ;;  %v1014_v25 = vmax.f32 %v2346_v19, 0.0 }
 0x1d6   : > { %v955_v28 = vmul.f32 %v2348_v21, %v2348_v21  ;;  %v1015_v29 = vmax.f32 %v2348_v21, 0.0 }
 0x1d7   : > { %v956_v30 = vadd.f32 %v954_v24, %v952_v22  ;;  %v1940_v31 = vpack.c.bf16 %v1014_v25, %v1012_v23  ;;  %v848_v23 = vpop.permute.xlu1 %847 }
 0x1d8   : > { %v963_v32 = vadd.f32 %v955_v28, %v953_v26  ;;  %v1938_v33 = vpack.c.bf16 %v1015_v29, %v1013_v27  ;;  %v1001_v26 = vpop.permute.xlu0 %1000  ;;  %v850_v27 = vmul.f32 %v848_v23, %v843_v18 }
 0x1d9   : > { %v957_v34 = vrot.slane %v956_v30, 4 }
 0x1da   : > { %v964_v35 = vrot.slane %v963_v32, 4  ;;  %1939 = vmatprep.subr.bf16.mxu0 %v1938_v33 }
 0x1db   : > { %v958_v36 = vadd.f32 %v957_v34, %v956_v30  ;;  %1941 = vmatpush1.bf16.msra.mxu0 %v1940_v31  ;;  %v1006_v29 = vpop.permute.xlu1 %1005 }
 0x1dc   : > { %v965_v38 = vadd.f32 %v964_v35, %v963_v32 }
 0x1dd   : > { %v959_v39 = vrot.slane %v958_v36, 2 }
 0x1de   : > { %v966_v40 = vrot.slane %v965_v38, 2  ;;  %1924 = vmatmul.mubr.msk.f32.vlgmr.msra.gmra.mrb[2].mxu0 %vm1030_vm7, %v1016_v37 }
 0x1df   : > { %v960_v41 = vadd.f32 %v959_v39, %v958_v36  ;;  %1107 = vmatprep.mubr.f32.mxu0 %v2090_v0 }
 0x1e0   : > { %v967_v43 = vadd.f32 %v966_v40, %v965_v38 }
 0x1e1   : > { %v961_v45 = vrot.slane %v960_v41, 1 }
 0x1e2   : > { %v968_v46 = vrot.slane %v967_v43, 1  ;;  %1925 = vmatmul.mubr.msk.f32.gmra.mrb[4].mxu0 %vm1030_vm7, %v1017_v42 }
 0x1e3   : > { %v962_v48 = vadd.f32 %v961_v45, %v960_v41  ;;  %1443 = vmatprep.mubr.f32.mxu0 %v2090_v0 }
 0x1e4   : > { %v969_v49 = vadd.f32 %v968_v46, %v967_v43 }
 0x1e5   : > { %2010 = vrsqrt.f32 %v962_v48  ;;  %vm972_vm8 = vcmp.eq.f32.partialorder %v962_v48, inf  ;;  %v975_v57 = vand.u32 2147483648, %v962_v48  ;;  %vm974_vm9 = vcmp.eq.f32.partialorder %v962_v48, 0.0 }
 0x1e6   : > { %2012 = vrsqrt.f32 %v969_v49  ;;  %vm979_vm10 = vcmp.eq.f32.partialorder %v969_v49, inf  ;;  %v982_v60 = vand.u32 2147483648, %v969_v49  ;;  %vm981_vm11 = vcmp.eq.f32.partialorder %v969_v49, 0.0 }
 0x1ef   : > { %v2011_v53 = vpop.eup %2010 }
 0x1f0   : > { %v2013_v55 = vpop.eup %2012  ;;  %v971_v56 = vmul.f32 %v2011_v53, %v962_v48 }
 0x1f1   : > { %v978_v58 = vmul.f32 %v2013_v55, %v969_v49 }
 0x1f2   : > { %v973_v59 = vsel %vm972_vm8, %v962_v48, %v971_v56 }
 0x1f3   : > { %v976_v62 = vsel %vm974_vm9, %v975_v57, %v973_v59  ;;  %v980_v63 = vsel %vm979_vm10, %v969_v49, %v978_v58  ;;  %vm715_vm9 = vcmask 0  }
 0x1f4   : > { %v984_v1 = vadd.f32 1e-10, %v976_v62  ;;  %v983_v2 = vsel %vm981_vm11, %v982_v60, %v980_v63  ;;  %v1179_v60 = vld [vmem:[%s2587_s5 + $0x8] sm:$0xff]  ;;  %716 = vst.msk [vmem:[#allocation2] sm:$0x1] %vm715_vm9, %v2090_v0 }
 0x1f5   : > { %v985_v4 = vadd.f32 1e-10, %v983_v2 }
 0x1f6   : > { %2014 = vrcp.f32 %v984_v1 }
 0x1f7   : > { %2016 = vrcp.f32 %v985_v4 }
 0x200   : > { %v2015_v8 = vpop.eup %2014 }
 0x201   : > { %v2017_v9 = vpop.eup %2016  ;;  %v990_v12 = vmul.f32 %v2015_v8, %v2346_v19  ;;  %v988_v13 = vmul.f32 %v2015_v8, %v2342_v15 }
 0x202   : > { %v989_v14 = vmul.f32 %v2017_v9, %v2344_v17  ;;  %v991_v16 = vmul.f32 %v2017_v9, %v2348_v21 }
 0x204   : > { %v992_v20 = vsub.f32 %v988_v13, %v989_v14  ;;  %v993_v22 = vsub.f32 %v990_v12, %v991_v16 }
 0x206   : > { %v994_v24 = vmul.f32 %v992_v20, %v992_v20  ;;  %v995_v25 = vmul.f32 %v993_v22, %v993_v22 }
 0x208   : > { %v1008_v28 = vmul.f32 %v1001_v26, %v994_v24  ;;  %v1009_v30 = vmul.f32 %v1006_v29, %v995_v25 }
 0x20a   : > { %v1010_v19 = vadd.f32 %v1008_v28, %v850_v27 }
 0x20c   : > { %v2398_v31 = vadd.f32 %v1010_v19, %v1009_v30 }
 0x2b1   : > { %v1103_v15 = vpop.f32.mrb[2].mxu0 }
 0x2b2   : > { %v1105_v17 = vpop.f32.mrb[3].mxu0  ;;  %v1104_v32 = vadd.f32 %v1103_v15, %v1023_v44 }
 0x2b3   : > { %v1106_v21 = vadd.f32 %v1105_v17, %v1023_v44 }
 0x2b4   : > { %v1114_v36 = vmul.f32 %v1104_v32, %v1104_v32  ;;  %v1174_v37 = vmax.f32 %v1104_v32, 0.0 }
 0x2b5   : > { %v1109_v33 = vpop.f32.mrb[4].mxu0  ;;  %v1115_v40 = vmul.f32 %v1106_v21, %v1106_v21  ;;  %v1175_v41 = vmax.f32 %v1106_v21, 0.0 }
 0x2b6   : > { %v1110_v34 = vadd.f32 %v1109_v33, %v1028_v47  ;;  %v1111_v11 = vpop.f32.mrb[5].mxu0 }
 0x2b7   : > { %v1112_v35 = vadd.f32 %v1111_v11, %v1028_v47  ;;  %v1178_v47 = vld [vmem:[%s2587_s5] sm:$0xff] }
 0x2b8   : > { %v1116_v38 = vmul.f32 %v1110_v34, %v1110_v34  ;;  %v1176_v39 = vmax.f32 %v1110_v34, 0.0 }
 0x2b9   : > { %v1117_v42 = vmul.f32 %v1112_v35, %v1112_v35  ;;  %v1177_v43 = vmax.f32 %v1112_v35, 0.0 }
 0x2ba   : > { %v1118_v45 = vadd.f32 %v1116_v38, %v1114_v36  ;;  %v1944_v46 = vpack.c.bf16 %v1176_v39, %v1174_v37  ;;  %v1163_v36 = vpop.permute.xlu0 %1162  ;;  %v1168_v38 = vpop.permute.xlu1 %1167 }
 0x2bb   : > { %v1125_v48 = vadd.f32 %v1117_v42, %v1115_v40  ;;  %v1942_v49 = vpack.c.bf16 %v1177_v43, %v1175_v41 }
 0x2bc   : > { %v1119_v53 = vrot.slane %v1118_v45, 4 }
 0x2bd   : > { %v1126_v55 = vrot.slane %v1125_v48, 4  ;;  %1943 = vmatprep.subr.bf16.mxu1 %v1942_v49 }
 0x2be   : > { %v1120_v44 = vadd.f32 %v1119_v53, %v1118_v45  ;;  %1945 = vmatpush1.bf16.msra.mxu1 %v1944_v46 }
 0x2bf   : > { %v1127_v56 = vadd.f32 %v1126_v55, %v1125_v48 }
 0x2c0   : > { %v1121_v57 = vrot.slane %v1120_v44, 2 }
 0x2c1   : > { %v1128_v58 = vrot.slane %v1127_v56, 2  ;;  %1926 = vmatmul.mubr.msk.f32.vlgmr.msra.gmra.mrb[4].mxu1 %vm1030_vm7, %v1178_v47 }
 0x2c2   : > { %v1122_v59 = vadd.f32 %v1121_v57, %v1120_v44  ;;  %1268 = vmatprep.mubr.f32.mxu1 %v2090_v0 }
 0x2c3   : > { %v1129_v62 = vadd.f32 %v1128_v58, %v1127_v56 }
 0x2c4   : > { %v1123_v63 = vrot.slane %v1122_v59, 1 }
 0x2c5   : > { %v1130_v1 = vrot.slane %v1129_v62, 1  ;;  %1927 = vmatmul.mubr.msk.f32.gmra.mrb[6].mxu1 %vm1030_vm7, %v1179_v60 }
 0x2c6   : > { %v1124_v2 = vadd.f32 %v1123_v63, %v1122_v59  ;;  %1673 = vmatprep.mubr.f32.mxu1 %v2090_v0  ;;  %v1339_v63 = vld [vmem:[%s2588_s6] sm:$0xff] }
 0x2c7   : > { %v1131_v4 = vadd.f32 %v1130_v1, %v1129_v62 }
 0x2c8   : > { %2018 = vrsqrt.f32 %v1124_v2  ;;  %vm1134_vm12 = vcmp.eq.f32.partialorder %v1124_v2, inf  ;;  %v1137_v13 = vand.u32 2147483648, %v1124_v2  ;;  %vm1136_vm13 = vcmp.eq.f32.partialorder %v1124_v2, 0.0 }
 0x2c9   : > { %2020 = vrsqrt.f32 %v1131_v4  ;;  %vm1141_vm14 = vcmp.eq.f32.partialorder %v1131_v4, inf  ;;  %v1144_v18 = vand.u32 2147483648, %v1131_v4  ;;  %vm1143_vm15 = vcmp.eq.f32.partialorder %v1131_v4, 0.0 }
 0x2d2   : > { %v2019_v8 = vpop.eup %2018 }
 0x2d3   : > { %v2021_v9 = vpop.eup %2020  ;;  %v1133_v12 = vmul.f32 %v2019_v8, %v1124_v2 }
 0x2d4   : > { %v1140_v14 = vmul.f32 %v2021_v9, %v1131_v4  ;;  %v1340_v9 = vld [vmem:[%s2588_s6 + $0x8] sm:$0xff] }
 0x2d5   : > { %v1135_v16 = vsel %vm1134_vm12, %v1124_v2, %v1133_v12 }
 0x2d6   : > { %v1138_v20 = vsel %vm1136_vm13, %v1137_v13, %v1135_v16  ;;  %v1142_v22 = vsel %vm1141_vm14, %v1131_v4, %v1140_v14 }
 0x2d7   : > { %v1146_v23 = vadd.f32 1e-10, %v1138_v20  ;;  %v1145_v24 = vsel %vm1143_vm15, %v1144_v18, %v1142_v22  ;;  %v1341_v18 = vld [vmem:[%s2588_s6 + $0x10] sm:$0xff]  ;;  %v1342_v22 = vld [vmem:[%s2588_s6 + $0x18] sm:$0xff] }
 0x2d8   : > { %v1147_v25 = vadd.f32 1e-10, %v1145_v24 }
 0x2d9   : > { %2022 = vrcp.f32 %v1146_v23 }
 0x2da   : > { %2024 = vrcp.f32 %v1147_v25 }
 0x2e3   : > { %v2023_v26 = vpop.eup %2022 }
 0x2e4   : > { %v2025_v27 = vpop.eup %2024  ;;  %v1152_v28 = vmul.f32 %v2023_v26, %v1110_v34  ;;  %v1150_v29 = vmul.f32 %v2023_v26, %v1104_v32 }
 0x2e5   : > { %v1151_v30 = vmul.f32 %v2025_v27, %v1106_v21  ;;  %v1153_v19 = vmul.f32 %v2025_v27, %v1112_v35 }
 0x2e7   : > { %v1154_v15 = vsub.f32 %v1150_v29, %v1151_v30  ;;  %v1155_v17 = vsub.f32 %v1152_v28, %v1153_v19 }
 0x2e9   : > { %v1156_v33 = vmul.f32 %v1154_v15, %v1154_v15  ;;  %v1157_v11 = vmul.f32 %v1155_v17, %v1155_v17 }
 0x2eb   : > { %v1170_v37 = vmul.f32 %v1163_v36, %v1156_v33  ;;  %v1171_v39 = vmul.f32 %v1168_v38, %v1157_v11 }
 0x2ed   : > { %v1172_v40 = vadd.f32 %v1170_v37, %v2398_v31 }
 0x2ef   : > { %v2411_v41 = vadd.f32 %v1172_v40, %v1171_v39 }
 0x394   : > { %v1264_v42 = vpop.f32.mrb[4].mxu1 }
 0x395   : > { %v1266_v43 = vpop.f32.mrb[5].mxu1  ;;  %v2414_v45 = vadd.f32 %v1264_v42, %v2372_v50 }
 0x396   : > { %v2417_v32 = vadd.f32 %v1266_v43, %v2372_v50 }
 0x397   : > { %v1275_v31 = vmul.f32 %v2414_v45, %v2414_v45  ;;  %v1335_v48 = vmax.f32 %v2414_v45, 0.0 }
 0x398   : > { %v1270_v21 = vpop.f32.mrb[6].mxu1  ;;  %v1276_v55 = vmul.f32 %v2417_v32, %v2417_v32  ;;  %v1336_v50 = vmax.f32 %v2417_v32, 0.0 }
 0x399   : > { %v1271_v34 = vadd.f32 %v1270_v21, %v2374_v51  ;;  %v1272_v35 = vpop.f32.mrb[7].mxu1 }
 0x39a   : > { %v2421_v46 = vadd.f32 %v1272_v35, %v2374_v51 }
 0x39b   : > { %v1277_v49 = vmul.f32 %v1271_v34, %v1271_v34  ;;  %v1337_v53 = vmax.f32 %v1271_v34, 0.0 }
 0x39c   : > { %v1278_v44 = vmul.f32 %v2421_v46, %v2421_v46  ;;  %v1338_v47 = vmax.f32 %v2421_v46, 0.0 }
 0x39d   : > { %v1279_v56 = vadd.f32 %v1277_v49, %v1275_v31  ;;  %v1948_v51 = vpack.c.bf16 %v1337_v53, %v1335_v48  ;;  %v1324_v31 = vpop.permute.xlu0 %1323  ;;  %v1329_v49 = vpop.permute.xlu1 %1328 }
 0x39e   : > { %v1286_v57 = vadd.f32 %v1278_v44, %v1276_v55  ;;  %v1946_v58 = vpack.c.bf16 %v1338_v47, %v1336_v50 }
 0x39f   : > { %v1280_v59 = vrot.slane %v1279_v56, 4 }
 0x3a0   : > { %v1287_v60 = vrot.slane %v1286_v57, 4  ;;  %1947 = vmatprep.subr.bf16.mxu0 %v1946_v58 }
 0x3a1   : > { %v1281_v62 = vadd.f32 %v1280_v59, %v1279_v56  ;;  %1949 = vmatpush1.bf16.msra.mxu0 %v1948_v51 }
 0x3a2   : > { %v1288_v1 = vadd.f32 %v1287_v60, %v1286_v57 }
 0x3a3   : > { %v1282_v2 = vrot.slane %v1281_v62, 2 }
 0x3a4   : > { %v1289_v4 = vrot.slane %v1288_v1, 2  ;;  %1928 = vmatmul.mubr.msk.f32.vlgmr.msra.gmra.mrb[6].mxu0 %vm1030_vm7, %v1339_v63 }
 0x3a5   : > { %v1283_v8 = vadd.f32 %v1282_v2, %v1281_v62  ;;  %1449 = vmatprep.mubr.f32.mxu0 %v2090_v0 }
 0x3a6   : > { %v1290_v12 = vadd.f32 %v1289_v4, %v1288_v1 }
 0x3a7   : > { %v1284_v13 = vrot.slane %v1283_v8, 1 }
 0x3a8   : > { %v1291_v14 = vrot.slane %v1290_v12, 1  ;;  %1929 = vmatmul.mubr.msk.f32.gmra.mrb[8].mxu0 %vm1030_vm7, %v1340_v9 }
 0x3a9   : > { %v1285_v16 = vadd.f32 %v1284_v13, %v1283_v8  ;;  %1455 = vmatprep.mubr.f32.mxu0 %v2090_v0 }
 0x3aa   : > { %v1292_v20 = vadd.f32 %v1291_v14, %v1290_v12 }
 0x3ab   : > { %2026 = vrsqrt.f32 %v1285_v16  ;;  %vm1295_vm0 = vcmp.eq.f32.partialorder %v1285_v16, inf  ;;  %v1298_v26 = vand.u32 2147483648, %v1285_v16  ;;  %vm1297_vm1 = vcmp.eq.f32.partialorder %v1285_v16, 0.0 }
 0x3ac   : > { %2028 = vrsqrt.f32 %v1292_v20  ;;  %1930 = vmatmul.mubr.msk.f32.gmra.mrb[10].mxu0 %vm1030_vm7, %v1341_v18  ;;  %vm1302_vm2 = vcmp.eq.f32.partialorder %v1292_v20, inf  ;;  %v1305_v29 = vand.u32 2147483648, %v1292_v20  ;;  %vm1304_vm3 = vcmp.eq.f32.partialorder %v1292_v20, 0.0 }
 0x3ad   : > { %1461 = vmatprep.mubr.f32.mxu0 %v2090_v0 }
 0x3b0   : > { %1931 = vmatmul.mubr.msk.f32.gmra.mrb[12].mxu0 %vm1030_vm7, %v1342_v22 }
 0x3b5   : > { %v2027_v23 = vpop.eup %2026 }
 0x3b6   : > { %v2029_v24 = vpop.eup %2028  ;;  %v1294_v25 = vmul.f32 %v2027_v23, %v1285_v16 }
 0x3b7   : > { %v1301_v27 = vmul.f32 %v2029_v24, %v1292_v20 }
 0x3b8   : > { %v1296_v28 = vsel %vm1295_vm0, %v1285_v16, %v1294_v25 }
 0x3b9   : > { %v1299_v30 = vsel %vm1297_vm1, %v1298_v26, %v1296_v28  ;;  %v1303_v19 = vsel %vm1302_vm2, %v1292_v20, %v1301_v27 }
 0x3ba   : > { %v1307_v15 = vadd.f32 1e-10, %v1299_v30  ;;  %v1306_v17 = vsel %vm1304_vm3, %v1305_v29, %v1303_v19 }
 0x3bb   : > { %v1308_v33 = vadd.f32 1e-10, %v1306_v17 }
 0x3bc   : > { %2030 = vrcp.f32 %v1307_v15 }
 0x3bd   : > { %2032 = vrcp.f32 %v1308_v33 }
 0x3c6   : > { %v2031_v11 = vpop.eup %2030 }
 0x3c7   : > { %v2033_v36 = vpop.eup %2032  ;;  %v1313_v37 = vmul.f32 %v2031_v11, %v1271_v34  ;;  %v1311_v38 = vmul.f32 %v2031_v11, %v2414_v45 }
 0x3c8   : > { %v1312_v39 = vmul.f32 %v2033_v36, %v2417_v32  ;;  %v1314_v40 = vmul.f32 %v2033_v36, %v2421_v46 }
 0x3ca   : > { %v1315_v42 = vsub.f32 %v1311_v38, %v1312_v39  ;;  %v1316_v43 = vsub.f32 %v1313_v37, %v1314_v40  ;;  %v1568_v37 = vld [vmem:[%s2589_s7] sm:$0xff] }
 0x3cc   : > { %v1317_v21 = vmul.f32 %v1315_v42, %v1315_v42  ;;  %v1318_v35 = vmul.f32 %v1316_v43, %v1316_v43  ;;  %v1569_v43 = vld [vmem:[%s2589_s7 + $0x8] sm:$0xff] }
 0x3ce   : > { %v1331_v48 = vmul.f32 %v1324_v31, %v1317_v21  ;;  %v1332_v53 = vmul.f32 %v1329_v49, %v1318_v35  ;;  %v1570_v49 = vld [vmem:[%s2589_s7 + $0x10] sm:$0xff] }
 0x3d0   : > { %v1333_v55 = vadd.f32 %v1331_v48, %v2411_v41 }
 0x3d2   : > { %v2455_v50 = vadd.f32 %v1333_v55, %v1332_v53  ;;  %v1571_v55 = vld [vmem:[%s2589_s7 + $0x18] sm:$0xff] }
 0x477   : > { %v1445_v44 = vpop.f32.mrb[6].mxu0 }
 0x478   : > { %v1447_v34 = vpop.f32.mrb[7].mxu0  ;;  %v2458_v45 = vadd.f32 %v1445_v44, %v2376_v52 }
 0x479   : > { %v2461_v32 = vadd.f32 %v1447_v34, %v2376_v52 }
 0x47a   : > { %v1468_v41 = vmul.f32 %v2458_v45, %v2458_v45  ;;  %v1560_v57 = vmax.f32 %v2458_v45, 0.0 }
 0x47b   : > { %v1451_v46 = vpop.f32.mrb[8].mxu0  ;;  %v1469_v52 = vmul.f32 %v2461_v32, %v2461_v32  ;;  %v1561_v60 = vmax.f32 %v2461_v32, 0.0 }
 0x47c   : > { %v2464_v47 = vadd.f32 %v1451_v46, %v2378_v54  ;;  %v1453_v56 = vpop.f32.mrb[9].mxu0 }
 0x47d   : > { %v2467_v51 = vadd.f32 %v1453_v56, %v2378_v54 }
 0x47e   : > { %v1470_v58 = vmul.f32 %v2464_v47, %v2464_v47  ;;  %v1562_v59 = vmax.f32 %v2464_v47, 0.0 }
 0x47f   : > { %v1471_v62 = vmul.f32 %v2467_v51, %v2467_v51  ;;  %v1563_v54 = vmax.f32 %v2467_v51, 0.0  ;;  %v1457_v63 = vpop.f32.mrb[10].mxu0 }
 0x480   : > { %v1476_v1 = vadd.f32 %v1470_v58, %v1468_v41  ;;  %v1952_v2 = vpack.c.bf16 %v1562_v59, %v1560_v57  ;;  %v2482_v4 = vadd.f32 %v1457_v63, %v2380_v61  ;;  %v1459_v8 = vpop.f32.mrb[11].mxu0 }
 0x481   : > { %v1485_v9 = vadd.f32 %v1471_v62, %v1469_v52  ;;  %v2485_v12 = vadd.f32 %v1459_v8, %v2380_v61  ;;  %v1950_v13 = vpack.c.bf16 %v1563_v54, %v1561_v60 }
 0x482   : > { %v1472_v14 = vmul.f32 %v2482_v4, %v2482_v4  ;;  %v1564_v61 = vmax.f32 %v2482_v4, 0.0 }
 0x483   : > { %v1473_v16 = vmul.f32 %v2485_v12, %v2485_v12  ;;  %v1463_v18 = vpop.f32.mrb[12].mxu0  ;;  %1951 = vmatprep.subr.bf16.mxu1 %v1950_v13  ;;  %v1565_v28 = vmax.f32 %v2485_v12, 0.0 }
 0x484   : > { %v1477_v20 = vadd.f32 %v1476_v1, %v1472_v14  ;;  %v2492_v22 = vadd.f32 %v1463_v18, %v2382_v3  ;;  %v1465_v23 = vpop.f32.mrb[13].mxu0  ;;  %1953 = vmatpush1.bf16.msra.mxu1 %v1952_v2 }
 0x485   : > { %v1486_v24 = vadd.f32 %v1485_v9, %v1473_v16  ;;  %v2495_v25 = vadd.f32 %v1465_v23, %v2382_v3 }
 0x486   : > { %v1474_v26 = vmul.f32 %v2492_v22, %v2492_v22  ;;  %v1566_v27 = vmax.f32 %v2492_v22, 0.0 }
 0x487   : > { %v1475_v29 = vmul.f32 %v2495_v25, %v2495_v25  ;;  %v1567_v30 = vmax.f32 %v2495_v25, 0.0 }
 0x488   : > { %v1478_v19 = vadd.f32 %v1477_v20, %v1474_v26  ;;  %v1956_v15 = vpack.c.bf16 %v1566_v27, %v1564_v61  ;;  %v1535_v27 = vpop.permute.xlu0 %1534 }
 0x489   : > { %v1487_v17 = vadd.f32 %v1486_v24, %v1475_v29  ;;  %v1954_v33 = vpack.c.bf16 %v1567_v30, %v1565_v28 }
 0x48a   : > { %v1479_v3 = vrot.slane %v1478_v19, 4 }
 0x48b   : > { %v1488_v11 = vrot.slane %v1487_v17, 4  ;;  %1955 = vmatprep.subr.bf16.mxu1 %v1954_v33 }
 0x48c   : > { %v1480_v36 = vadd.f32 %v1479_v3, %v1478_v19  ;;  %1957 = vmatpush1.bf16.msra.mxu1 %v1956_v15  ;;  %v1545_v19 = vpop.permute.xlu0 %1544 }
 0x48d   : > { %v1489_v38 = vadd.f32 %v1488_v11, %v1487_v17 }
 0x48e   : > { %v1481_v39 = vrot.slane %v1480_v36, 2 }
 0x48f   : > { %v1490_v40 = vrot.slane %v1489_v38, 2  ;;  %1932 = vmatmul.mubr.msk.f32.vlgmr.msra.gmra.mrb[8].mxu1 %vm1596_vm4, %v1568_v37 }
 0x490   : > { %v1482_v42 = vadd.f32 %v1481_v39, %v1480_v36  ;;  %1679 = vmatprep.mubr.f32.mxu1 %v2090_v0 }
 0x491   : > { %v1491_v21 = vadd.f32 %v1490_v40, %v1489_v38 }
 0x492   : > { %v1483_v35 = vrot.slane %v1482_v42, 1 }
 0x493   : > { %v1492_v31 = vrot.slane %v1491_v21, 1  ;;  %1933 = vmatmul.mubr.msk.f32.gmra.mrb[10].mxu1 %vm1596_vm4, %v1569_v43 }
 0x494   : > { %v1484_v48 = vadd.f32 %v1483_v35, %v1482_v42  ;;  %1685 = vmatprep.mubr.f32.mxu1 %v2090_v0 }
 0x495   : > { %v1493_v53 = vadd.f32 %v1492_v31, %v1491_v21 }
 0x496   : > { %2034 = vrsqrt.f32 %v1484_v48  ;;  %vm1496_vm5 = vcmp.eq.f32.partialorder %v1484_v48, inf  ;;  %v1499_v56 = vand.u32 2147483648, %v1484_v48  ;;  %vm1498_vm6 = vcmp.eq.f32.partialorder %v1484_v48, 0.0 }
 0x497   : > { %2036 = vrsqrt.f32 %v1493_v53  ;;  %1934 = vmatmul.mubr.msk.f32.gmra.mrb[12].mxu1 %vm1596_vm4, %v1570_v49  ;;  %vm1503_vm7 = vcmp.eq.f32.partialorder %v1493_v53, inf  ;;  %v1506_v58 = vand.u32 2147483648, %v1493_v53  ;;  %vm1505_vm8 = vcmp.eq.f32.partialorder %v1493_v53, 0.0 }
 0x498   : > { %1691 = vmatprep.mubr.f32.mxu1 %v2090_v0 }
 0x49b   : > { %1935 = vmatmul.mubr.msk.f32.gmra.mrb[14].mxu1 %vm1596_vm4, %v1571_v55 }
 0x4a0   : > { %v2035_v44 = vpop.eup %2034 }
 0x4a1   : > { %v2037_v34 = vpop.eup %2036  ;;  %v1495_v46 = vmul.f32 %v2035_v44, %v1484_v48 }
 0x4a2   : > { %v1502_v41 = vmul.f32 %v2037_v34, %v1493_v53 }
 0x4a3   : > { %v1497_v57 = vsel %vm1496_vm5, %v1484_v48, %v1495_v46 }
 0x4a4   : > { %v1500_v59 = vsel %vm1498_vm6, %v1499_v56, %v1497_v57  ;;  %v1504_v52 = vsel %vm1503_vm7, %v1493_v53, %v1502_v41 }
 0x4a5   : > { %v1508_v60 = vadd.f32 1e-10, %v1500_v59  ;;  %v1507_v62 = vsel %vm1505_vm8, %v1506_v58, %v1504_v52 }
 0x4a6   : > { %v1509_v54 = vadd.f32 1e-10, %v1507_v62 }
 0x4a7   : > { %2038 = vrcp.f32 %v1508_v60 }
 0x4a8   : > { %2040 = vrcp.f32 %v1509_v54 }
 0x4b1   : > { %v2039_v63 = vpop.eup %2038 }
 0x4b2   : > { %v2041_v1 = vpop.eup %2040  ;;  %v1518_v2 = vmul.f32 %v2039_v63, %v2492_v22  ;;  %v1512_v8 = vmul.f32 %v2039_v63, %v2458_v45  ;;  %v1514_v9 = vmul.f32 %v2039_v63, %v2464_v47  ;;  %v1516_v13 = vmul.f32 %v2039_v63, %v2482_v4  ;;  %v1540_v45 = vpop.permute.xlu1 %1539 }
 0x4b3   : > { %v1513_v14 = vmul.f32 %v2041_v1, %v2461_v32  ;;  %v1515_v16 = vmul.f32 %v2041_v1, %v2467_v51  ;;  %v1517_v18 = vmul.f32 %v2041_v1, %v2485_v12  ;;  %v1519_v20 = vmul.f32 %v2041_v1, %v2495_v25 }
 0x4b5   : > { %v1520_v23 = vsub.f32 %v1512_v8, %v1513_v14  ;;  %v1521_v24 = vsub.f32 %v1514_v9, %v1515_v16  ;;  %v1522_v61 = vsub.f32 %v1516_v13, %v1517_v18  ;;  %v1523_v26 = vsub.f32 %v1518_v2, %v1519_v20 }
 0x4b6   : > { %v1550_v12 = vpop.permute.xlu1 %1549 }
 0x4b7   : > { %v1524_v22 = vmul.f32 %v1520_v23, %v1520_v23  ;;  %v1525_v28 = vmul.f32 %v1521_v24, %v1521_v24  ;;  %v1526_v29 = vmul.f32 %v1522_v61, %v1522_v61  ;;  %v1527_v30 = vmul.f32 %v1523_v26, %v1523_v26 }
 0x4b9   : > { %v1552_v47 = vmul.f32 %v1535_v27, %v1524_v22  ;;  %v1553_v4 = vmul.f32 %v1540_v45, %v1525_v28  ;;  %v1554_v51 = vmul.f32 %v1545_v19, %v1526_v29  ;;  %v1555_v17 = vmul.f32 %v1550_v12, %v1527_v30 }
 0x4bb   : > { %v1556_v32 = vadd.f32 %v1552_v47, %v2455_v50 }
 0x4bd   : > { %v1557_v15 = vadd.f32 %v1556_v32, %v1553_v4 }
 0x4bf   : > { %v1558_v25 = vadd.f32 %v1557_v15, %v1554_v51 }
 0x4c1   : > { %v2533_v33 = vadd.f32 %v1558_v25, %v1555_v17 }
 0x562   : > { %v1675_v3 = vpop.f32.mrb[8].mxu1 }
 0x563   : > { %v1677_v11 = vpop.f32.mrb[9].mxu1  ;;  %v2538_v36 = vadd.f32 %v1675_v3, %v2384_v5 }
 0x564   : > { %v2541_v37 = vadd.f32 %v1677_v11, %v2384_v5 }
 0x565   : > { %v1698_v42 = vmul.f32 %v2538_v36, %v2538_v36 }
 0x566   : > { %v1681_v50 = vpop.f32.mrb[10].mxu1  ;;  %v1699_v0 = vmul.f32 %v2541_v37, %v2541_v37 }
 0x567   : > { %v1682_v38 = vadd.f32 %v1681_v50, %v2386_v6  ;;  %v1683_v39 = vpop.f32.mrb[11].mxu1 }
 0x568   : > { %v2545_v40 = vadd.f32 %v1683_v39, %v2386_v6 }
 0x569   : > { %v1700_v43 = vmul.f32 %v1682_v38, %v1682_v38 }
 0x56a   : > { %v1701_v21 = vmul.f32 %v2545_v40, %v2545_v40  ;;  %v1687_v35 = vpop.f32.mrb[12].mxu1 }
 0x56b   : > { %v1706_v5 = vadd.f32 %v1700_v43, %v1698_v42  ;;  %v1688_v31 = vadd.f32 %v1687_v35, %v2388_v7  ;;  %v1689_v48 = vpop.f32.mrb[13].mxu1  ;;  %v1765_v43 = vpop.permute.xlu0 %1764 }
 0x56c   : > { %v1715_v49 = vadd.f32 %v1701_v21, %v1699_v0  ;;  %v1690_v53 = vadd.f32 %v1689_v48, %v2388_v7  ;;  %v1770_v35 = vpop.permute.xlu1 %1769 }
 0x56d   : > { %v1702_v6 = vmul.f32 %v1688_v31, %v1688_v31 }
 0x56e   : > { %v1703_v55 = vmul.f32 %v1690_v53, %v1690_v53  ;;  %v1693_v44 = vpop.f32.mrb[14].mxu1 }
 0x56f   : > { %v1707_v34 = vadd.f32 %v1706_v5, %v1702_v6  ;;  %v1694_v46 = vadd.f32 %v1693_v44, %v2390_v10  ;;  %v1695_v56 = vpop.f32.mrb[15].mxu1 }
 0x570   : > { %v1716_v41 = vadd.f32 %v1715_v49, %v1703_v55  ;;  %v1696_v57 = vadd.f32 %v1695_v56, %v2390_v10 }
 0x571   : > { %v1704_v58 = vmul.f32 %v1694_v46, %v1694_v46 }
 0x572   : > { %v1705_v59 = vmul.f32 %v1696_v57, %v1696_v57 }
 0x573   : > { %v1708_v52 = vadd.f32 %v1707_v34, %v1704_v58 }
 0x574   : > { %v1717_v60 = vadd.f32 %v1716_v41, %v1705_v59  ;;  %v1798_v59 = vld [vmem:[#allocation2] sm:$0x1] }
 0x575   : > { %v1709_v62 = vrot.slane %v1708_v52, 4 }
 0x576   : > { %v1718_v54 = vrot.slane %v1717_v60, 4 }
 0x577   : > { %v1710_v63 = vadd.f32 %v1709_v62, %v1708_v52 }
 0x578   : > { %v1719_v1 = vadd.f32 %v1718_v54, %v1717_v60 }
 0x579   : > { %v1711_v2 = vrot.slane %v1710_v63, 2 }
 0x57a   : > { %v1720_v7 = vrot.slane %v1719_v1, 2 }
 0x57b   : > { %v1712_v8 = vadd.f32 %v1711_v2, %v1710_v63 }
 0x57c   : > { %v1721_v9 = vadd.f32 %v1720_v7, %v1719_v1 }
 0x57d   : > { %v1713_v13 = vrot.slane %v1712_v8, 1 }
 0x57e   : > { %v1722_v14 = vrot.slane %v1721_v9, 1 }
 0x57f   : > { %v1714_v16 = vadd.f32 %v1713_v13, %v1712_v8 }
 0x580   : > { %v1723_v18 = vadd.f32 %v1722_v14, %v1721_v9 }
 0x581   : > { %2042 = vrsqrt.f32 %v1714_v16  ;;  %vm1726_vm10 = vcmp.eq.f32.partialorder %v1714_v16, inf  ;;  %v1729_v24 = vand.u32 2147483648, %v1714_v16  ;;  %vm1728_vm11 = vcmp.eq.f32.partialorder %v1714_v16, 0.0 }
 0x582   : > { %2044 = vrsqrt.f32 %v1723_v18  ;;  %vm1733_vm12 = vcmp.eq.f32.partialorder %v1723_v18, inf  ;;  %v1736_v27 = vand.u32 2147483648, %v1723_v18  ;;  %vm1735_vm13 = vcmp.eq.f32.partialorder %v1723_v18, 0.0 }
 0x58b   : > { %v2043_v20 = vpop.eup %2042 }
 0x58c   : > { %v2045_v10 = vpop.eup %2044  ;;  %v1725_v23 = vmul.f32 %v2043_v20, %v1714_v16 }
 0x58d   : > { %v1732_v61 = vmul.f32 %v2045_v10, %v1723_v18 }
 0x58e   : > { %v1727_v26 = vsel %vm1726_vm10, %v1714_v16, %v1725_v23 }
 0x58f   : > { %v1730_v22 = vsel %vm1728_vm11, %v1729_v24, %v1727_v26  ;;  %v1734_v28 = vsel %vm1733_vm12, %v1723_v18, %v1732_v61 }
 0x590   : > { %v1738_v45 = vadd.f32 1e-10, %v1730_v22  ;;  %v1737_v29 = vsel %vm1735_vm13, %v1736_v27, %v1734_v28 }
 0x591   : > { %v1739_v47 = vadd.f32 1e-10, %v1737_v29 }
 0x592   : > { %2046 = vrcp.f32 %v1738_v45 }
 0x593   : > { %2048 = vrcp.f32 %v1739_v47 }
 0x59c   : > { %v2047_v30 = vpop.eup %2046 }
 0x59d   : > { %v2049_v4 = vpop.eup %2048  ;;  %v1748_v32 = vmul.f32 %v2047_v30, %v1694_v46  ;;  %v1742_v19 = vmul.f32 %v2047_v30, %v2538_v36  ;;  %v1744_v51 = vmul.f32 %v2047_v30, %v1682_v38  ;;  %v1746_v15 = vmul.f32 %v2047_v30, %v1688_v31  ;;  %v1775_v31 = vpop.permute.xlu0 %1774 }
 0x59e   : > { %v1749_v12 = vmul.f32 %v2049_v4, %v1696_v57  ;;  %v1743_v17 = vmul.f32 %v2049_v4, %v2541_v37  ;;  %v1745_v25 = vmul.f32 %v2049_v4, %v2545_v40  ;;  %v1747_v3 = vmul.f32 %v2049_v4, %v1690_v53  ;;  %v1780_v40 = vpop.permute.xlu1 %1779 }
 0x5a0   : > { %v1753_v11 = vsub.f32 %v1748_v32, %v1749_v12  ;;  %v1750_v50 = vsub.f32 %v1742_v19, %v1743_v17  ;;  %v1751_v39 = vsub.f32 %v1744_v51, %v1745_v25  ;;  %v1752_v42 = vsub.f32 %v1746_v15, %v1747_v3 }
 0x5a2   : > { %v1754_v0 = vmul.f32 %v1750_v50, %v1750_v50  ;;  %v1755_v21 = vmul.f32 %v1751_v39, %v1751_v39  ;;  %v1756_v5 = vmul.f32 %v1752_v42, %v1752_v42  ;;  %v1757_v49 = vmul.f32 %v1753_v11, %v1753_v11 }
 0x5a4   : > { %v1782_v48 = vmul.f32 %v1765_v43, %v1754_v0  ;;  %v1783_v36 = vmul.f32 %v1770_v35, %v1755_v21  ;;  %v1784_v6 = vmul.f32 %v1775_v31, %v1756_v5  ;;  %v1785_v53 = vmul.f32 %v1780_v40, %v1757_v49 }
 0x5a6   : > { %v1786_v38 = vadd.f32 %v1782_v48, %v2533_v33 }
 0x5a8   : > { %v1787_v37 = vadd.f32 %v1786_v38, %v1783_v36 }
 0x5aa   : > { %v1788_v55 = vadd.f32 %v1787_v37, %v1784_v6 }
 0x5ac   : > { %v1789_v44 = vadd.f32 %v1788_v55, %v1785_v53 }
 0x5ae   : > { %v1790_v34 = vrot.slane %v1789_v44, 4 }
 0x5b0   : > { %v1791_v46 = vadd.f32 %v1790_v34, %v1789_v44 }
 0x5b2   : > { %v1792_v56 = vrot.slane %v1791_v46, 2 }
 0x5b4   : > { %v1793_v41 = vadd.f32 %v1792_v56, %v1791_v46 }
 0x5b6   : > { %v1794_v57 = vrot.slane %v1793_v41, 1 }
 0x5b8   : > { %v1795_v58 = vadd.f32 %v1794_v57, %v1793_v41 }
 0x5ba   : > { %1796 = vadd.xlane.f32.xlu0 %v1795_v58 }
 0x647   : > { %v1797_v52 = vpop.xlane.xlu0 %1796 }
 0x648   : > { %v1799_v60 = vadd.f32 %v1798_v59, %v1797_v52 }
 0x64a   : > { %1801 = vst.msk [vmem:[#allocation2] sm:$0x1] %vm715_vm9, %v1799_v60 }
 0x651   : > { %v1805_v33 = vld [vmem:[#allocation2] sm:$0x1] }
 0x652   : > { %v1806_v62 = vmul.f32 0.00390625, %v1805_v33 }
 0x654   : > { %1807 = vst.msk [vmem:[%s710_s26] sm:$0x1] %vm715_vm9, %v1806_v62 }
 0x655 PF: > { %s2628_s27 = sld [smem:[#allocation5_spill]]  ;;  %s2629_s1 = sld [smem:[#allocation3_spill]] }
 0x656   : > { %s2630_s22 = sld [smem:[#allocation4_spill]]  ;;  %s2631_s23 = sld [smem:[#allocation6_spill]] }
 0x657   : > { %s2632_s24 = sld [smem:[#allocation7_spill]] }
 0x65b   : > { %s30_s2 = sadd.s32 1, %s2628_s27  }
 0x65c   : > { %p27_p7 = scmp.ge.s32.totalorder %s30_s2, 6  }
 0x65e   :  { %29 = sbr.rel (!%p27_p7) target bundleno = 8 (0x8), region = 141 }

</bundles_post_ra>
